<compile_context>
chip_gen: v5e
topology: v5e:2x2
jax: 0.10.0
libtpu: 0.0.40
codegen_flags: <defaults>
</compile_context>

<pallas_src>
import functools

import jax
import jax.numpy as jnp
from jax.experimental import pallas as pl
from jax.experimental.pallas import tpu as pltpu


def adapter_kernel(x_ref, w1_ref, b1_ref, w2_ref, b2_ref, o_ref):
    # x_ref: (TM, D) f32; w1: (D, H) bf16; w2: (H, D) bf16; biases f32.
    # Cast activations to bf16 in-kernel (free VPU slots under MXU/DMA slack),
    # accumulate both matmuls in f32, add f32 biases post-accumulation.
    x = x_ref[...].astype(jnp.bfloat16)
    h = jnp.dot(x, w1_ref[...], preferred_element_type=jnp.float32) + b1_ref[...]
    y = jnp.dot(h.astype(jnp.bfloat16), w2_ref[...],
                preferred_element_type=jnp.float32) + b2_ref[...]
    o_ref[...] = y.astype(o_ref.dtype)


def _select_tm(batch):
    """Largest row tile (<=512) that still yields >=2 grid steps.

    >=2 steps lets the 'parallel' batch axis split across both v7x
    TensorCores; big tiles amortize per-step overhead on 1-TC v5e/v6e.
    """
    if batch <= 8:
        return batch
    half = ((batch + 1) // 2 + 7) // 8 * 8  # ~batch/2, rounded up to 8 sublanes
    return min(512, half)


@functools.partial(jax.jit, static_argnames=("tm",))
def adapter_forward(x, w1, b1, w2, b2, *, tm=None):
    """x: (B, D) f32; w1: (D, H) bf16; b1: (1, H) f32; w2: (H, D) bf16; b2: (1, D) f32."""
    B, D = x.shape
    H = w1.shape[1]
    out_dtype = x.dtype

    if tm is None:
        tm = _select_tm(B)
    num_tiles = pl.cdiv(B, tm)  # ragged last tile handled by Pallas edge masking

    flops = 4 * B * D * H  # two matmuls
    bytes_accessed = (
        B * D * x.dtype.itemsize            # x streamed in (f32)
        + D * H * w1.dtype.itemsize         # w1 (bf16, resident)
        + H * D * w2.dtype.itemsize         # w2 (bf16, resident)
        + H * 4 + D * 4                     # biases (f32)
        + B * D * jnp.dtype(out_dtype).itemsize  # output
    )

    return pl.pallas_call(
        adapter_kernel,
        out_shape=jax.ShapeDtypeStruct((B, D), out_dtype),
        grid_spec=pltpu.PrefetchScalarGridSpec(
            num_scalar_prefetch=0,
            grid=(num_tiles,),
            in_specs=[
                pl.BlockSpec((tm, D), lambda i: (i, 0)),   # x tile: streamed
                pl.BlockSpec((D, H), lambda i: (0, 0)),    # w1: VMEM-resident
                pl.BlockSpec((1, H), lambda i: (0, 0)),    # b1: VMEM-resident
                pl.BlockSpec((H, D), lambda i: (0, 0)),    # w2: VMEM-resident
                pl.BlockSpec((1, D), lambda i: (0, 0)),    # b2: VMEM-resident
            ],
            out_specs=pl.BlockSpec((tm, D), lambda i: (i, 0)),
        ),
        compiler_params=pltpu.CompilerParams(
            dimension_semantics=("parallel",),
        ),
        cost_estimate=pl.CostEstimate(
            flops=flops, transcendentals=0, bytes_accessed=bytes_accessed),
    )(x, w1, b1, w2, b2)


if __name__ == "__main__":
    INPUT_DIM = 512   # module default
    HIDDEN = 256      # fc1 output / fc4 input
    BATCH = 256       # -> tm=128, grid=(2,): even, >=2 tiles for v7x megacore

    key = jax.random.PRNGKey(0)
    kx, k1, k2, k3, k4 = jax.random.split(key, 5)

    x = jax.random.normal(kx, (BATCH, INPUT_DIM), dtype=jnp.float32)

    # Deterministic synthetic parameters (stored transposed vs. nn.Linear.weight).
    w1_f32 = jax.random.normal(k1, (INPUT_DIM, HIDDEN), dtype=jnp.float32) * 0.02
    b1 = jax.random.normal(k2, (1, HIDDEN), dtype=jnp.float32) * 0.02
    w2_f32 = jax.random.normal(k3, (HIDDEN, INPUT_DIM), dtype=jnp.float32) * 0.02
    b2 = jax.random.normal(k4, (1, INPUT_DIM), dtype=jnp.float32) * 0.02

    # Persist weights in bf16 once at "parameter init" time (not per call).
    w1 = w1_f32.astype(jnp.bfloat16)
    w2 = w2_f32.astype(jnp.bfloat16)

    out = adapter_forward(x, w1, b1, w2, b2)
    out = jax.block_until_ready(out)

    # Reference in plain JAX (same math as torch: x @ W1.T + b1 then @ W4.T + b4).
    # Tolerance loosened vs. pure f32 because MXU operands are bf16 (f32 accum).
    ref = (x @ w1_f32 + b1) @ w2_f32 + b2
    assert out.shape == (BATCH, INPUT_DIM)
    assert jnp.allclose(out, ref, atol=1e-2, rtol=1e-2), (
        float(jnp.max(jnp.abs(out - ref))))

    print("KERNEL_OK")
</pallas_src>

<mosaic_0001>
module attributes {stable_mosaic.version = 11 : i64} {
  func.func @adapter_kernel(%arg0: i32, %arg1: memref<128x512xf32, #tpu.memory_space<vmem>>, %arg2: memref<512x256xbf16, #tpu.memory_space<vmem>>, %arg3: memref<1x256xf32, #tpu.memory_space<vmem>>, %arg4: memref<256x512xbf16, #tpu.memory_space<vmem>>, %arg5: memref<1x512xf32, #tpu.memory_space<vmem>>, %arg6: memref<128x512xf32, #tpu.memory_space<vmem>>) attributes {dimension_semantics = [#tpu.dimension_semantics<parallel>], iteration_bounds = array<i64: 2>, scalar_prefetch = 0 : i64, scratch_operands = 0 : i64, tpu.core_type = #tpu.core_type<tc>, window_params = [{transform_indices = @transform_0, window_bounds = array<i64: 128, 512>}, {pipeline_mode = #tpu.pipeline_mode<synchronous>, transform_indices = @transform_1, window_bounds = array<i64: 512, 256>}, {pipeline_mode = #tpu.pipeline_mode<synchronous>, transform_indices = @transform_2, window_bounds = array<i64: 1, 256>}, {pipeline_mode = #tpu.pipeline_mode<synchronous>, transform_indices = @transform_3, window_bounds = array<i64: 256, 512>}, {pipeline_mode = #tpu.pipeline_mode<synchronous>, transform_indices = @transform_4, window_bounds = array<i64: 1, 512>}, {transform_indices = @transform_5, window_bounds = array<i64: 128, 512>}]} {
    %c0 = arith.constant 0 : index
    %c0_0 = arith.constant 0 : index
    %0 = vector.load %arg1[%c0, %c0_0] : memref<128x512xf32, #tpu.memory_space<vmem>>, vector<128x512xf32>
    %1 = arith.truncf %0 : vector<128x512xf32> to vector<128x512xbf16>
    %c0_1 = arith.constant 0 : index
    %c0_2 = arith.constant 0 : index
    %2 = vector.load %arg2[%c0_1, %c0_2] : memref<512x256xbf16, #tpu.memory_space<vmem>>, vector<512x256xbf16>
    %cst = arith.constant dense<0.000000e+00> : vector<128x256xf32>
    %3 = tpu.matmul %1, %2, %cst {dimension_numbers = #tpu.dot_dimension_numbers<[1], [0], [0], [1], [0, 0, 1, 1], [], []>} : vector<128x512xbf16>, vector<512x256xbf16>, vector<128x256xf32> -> vector<128x256xf32>
    %c0_3 = arith.constant 0 : index
    %c0_4 = arith.constant 0 : index
    %4 = vector.load %arg3[%c0_3, %c0_4] : memref<1x256xf32, #tpu.memory_space<vmem>>, vector<1x256xf32>
    %5 = vector.broadcast %4 : vector<1x256xf32> to vector<128x256xf32>
    %6 = arith.addf %3, %5 : vector<128x256xf32>
    %7 = arith.truncf %6 : vector<128x256xf32> to vector<128x256xbf16>
    %c0_5 = arith.constant 0 : index
    %c0_6 = arith.constant 0 : index
    %8 = vector.load %arg4[%c0_5, %c0_6] : memref<256x512xbf16, #tpu.memory_space<vmem>>, vector<256x512xbf16>
    %cst_7 = arith.constant dense<0.000000e+00> : vector<128x512xf32>
    %9 = tpu.matmul %7, %8, %cst_7 {dimension_numbers = #tpu.dot_dimension_numbers<[1], [0], [0], [1], [0, 0, 1, 1], [], []>} : vector<128x256xbf16>, vector<256x512xbf16>, vector<128x512xf32> -> vector<128x512xf32>
    %c0_8 = arith.constant 0 : index
    %c0_9 = arith.constant 0 : index
    %10 = vector.load %arg5[%c0_8, %c0_9] : memref<1x512xf32, #tpu.memory_space<vmem>>, vector<1x512xf32>
    %11 = vector.broadcast %10 : vector<1x512xf32> to vector<128x512xf32>
    %12 = arith.addf %9, %11 : vector<128x512xf32>
    %c0_10 = arith.constant 0 : index
    %c0_11 = arith.constant 0 : index
    %13 = vector.load %arg6[%c0_10, %c0_11] : memref<128x512xf32, #tpu.memory_space<vmem>>, vector<128x512xf32>
    tpu.vector_store %arg6[%c0_10, %c0_11], %12 {strides = array<i32>} : memref<128x512xf32, #tpu.memory_space<vmem>>, vector<128x512xf32>,
    return
  }
  func.func @transform_0(%arg0: i32) -> (i32, i32) {
    %c0_i32 = arith.constant 0 : i32
    %c0_i32_0 = arith.constant 0 : i32
    return %arg0, %c0_i32 : i32, i32
  }
  func.func @transform_1(%arg0: i32) -> (i32, i32) {
    %c0_i32 = arith.constant 0 : i32
    %c0_i32_0 = arith.constant 0 : i32
    %c0_i32_1 = arith.constant 0 : i32
    return %c0_i32, %c0_i32_0 : i32, i32
  }
  func.func @transform_2(%arg0: i32) -> (i32, i32) {
    %c0_i32 = arith.constant 0 : i32
    %c0_i32_0 = arith.constant 0 : i32
    %c0_i32_1 = arith.constant 0 : i32
    return %c0_i32, %c0_i32_0 : i32, i32
  }
  func.func @transform_3(%arg0: i32) -> (i32, i32) {
    %c0_i32 = arith.constant 0 : i32
    %c0_i32_0 = arith.constant 0 : i32
    %c0_i32_1 = arith.constant 0 : i32
    return %c0_i32, %c0_i32_0 : i32, i32
  }
  func.func @transform_4(%arg0: i32) -> (i32, i32) {
    %c0_i32 = arith.constant 0 : i32
    %c0_i32_0 = arith.constant 0 : i32
    %c0_i32_1 = arith.constant 0 : i32
    return %c0_i32, %c0_i32_0 : i32, i32
  }
  func.func @transform_5(%arg0: i32) -> (i32, i32) {
    %c0_i32 = arith.constant 0 : i32
    %c0_i32_0 = arith.constant 0 : i32
    return %arg0, %c0_i32 : i32, i32
  }
}

</mosaic_0001>

<bundles_post_ra>
// kernel: adapter_forward.1
= control target key start
LH: loop header
LB: loop body
LE: loop exit
PB: predicated region body
PF: predicated region fallthrough
CT: control target
= control target key end

     0   :  { %10 = vsyncpa [#allocation3], 0  ;;  %s3855_s0 = inlined_call_operand.hbm [shape: f32[256,512], index: 0, kind: input, shape index: {}]   ;;  %s3856_s1 = inlined_call_operand.hbm [shape: bf16[512,256], index: 1, kind: input, shape index: {}]   ;;  %s3857_s2 = inlined_call_operand.hbm [shape: f32[1,256], index: 2, kind: input, shape index: {}]   ;;  %s3858_s3 = inlined_call_operand.hbm [shape: bf16[256,512], index: 3, kind: input, shape index: {}]   ;;  %s3859_s4 = inlined_call_operand.hbm [shape: f32[1,512], index: 4, kind: input, shape index: {}]   ;;  %s3860_s5 = inlined_call_operand.hbm [shape: f32[256,512], index: 5, kind: output, shape index: {}]  }
   0x1   :  { %12 = vsyncpa [#allocation3 + $0x1], 0 }
   0x2   :  { %13 = vsyncpa [#allocation6], 0 }
   0x3   :  { %14 = vsyncpa [#allocation9], 0 }
   0x4   :  { %15 = vsyncpa [#allocation4], 0 }
   0x5   :  { %17 = vsyncpa [#allocation4 + $0x1], 0  ;;  %s3213_s18 = smov 0   ;;  %s3215_s19 = smov 0  }
   0x6   :  { %s3217_s20 = smov 0   ;;  %s3219_s21 = smov 0  }
   0x7 LB: > { %s3234_s22 = sadd.s32 4294967295, %s3169_s21   ;;  %s2182_s23 = sadd.s32 4294967294, %s3169_s21   ;;  %s3169_s21 = sphi %s3219_s21, %s3871_s21   ;;  %s3165_s20 = sphi %s3217_s20, %s3870_s20   ;;  %s3161_s19 = sphi %s3215_s19, %s3869_s19   ;;  %s3157_s18 = sphi %s3213_s18, %s3868_s18  }
   0x8   : > { %p43_p0 = scmp.ne.s32.totalorder %s3161_s19, %s3157_s18  ;;  %p44_p1 = scmp.eq.s32.totalorder %s3234_s22, 0 }
   0x9   : > { %p151_p2 = scmp.eq.s32.totalorder %s3234_s22, 1  ;;  %p157_p3 = scmp.eq.s32.totalorder %s2182_s23, 1 }
   0xa   : > { %p3243_p4 = por %p44_p1, %p43_p0  ;;  %p2183_p5 = scmp.ge.s32.totalorder %s3169_s21, 1 }
   0xb   : > { %p3248_p6 = por %p157_p3, %p43_p0  ;;  %p164_p7 = scmp.lt.s32.totalorder %s3169_s21, 3 }
   0xc   : > { %s175_s28 = sshll.u32 %s3856_s1, 4  ;;  %s3171_s30 = smov [#allocation5]   ;;  %s176_s28 = int_to_ptr.hbm [resolvable:$true] %s175_s28 }
   0xd   : > { %p3256_p8 = pnand %p2183_p5, %p164_p7  ;;  %s177_s6 = sshll.u32 %s3171_s30, 4  ;;  %s178_s6 = int_to_ptr.vmem [resolvable:$true] %s177_s6 }
   0xe   : > { %s201_s10 = sshll.u32 %s3858_s3, 4  ;;  %s3172_s11 = smov 128   ;;  %s202_s10 = int_to_ptr.hbm [resolvable:$true] %s201_s10 }
   0xf   : > { %p2870_p9 = pneg %p3256_p8  ;;  %s3173_s12 = smov 8  }
  0x10   : > { %s3174_s13 = smov [#allocation8]   ;;  %s3175_s15 = smov 256  }
  0x11   : > { %p3264_p10 = pnand %p2870_p9, %p44_p1  ;;  %s203_s14 = sshll.u32 %s3174_s13, 4  ;;  %s204_s14 = int_to_ptr.vmem [resolvable:$true] %s203_s14 }
  0x12   : > { %s3176_s16 = smov 16   ;;  %s190_s26 = sshll.u32 %s3857_s2, 4  ;;  %s191_s26 = int_to_ptr.hbm [resolvable:$true] %s190_s26 }
  0x13   : > { %2873 = dma.hbm_to_vmem [thread:$0]  (!%p3264_p10), %s176_s28, 8192, %s178_s6, [#allocation6], %s3172_s11, %s3172_s11, %s3173_s12  }
  0x14   : > { %2879 = dma.hbm_to_vmem [thread:$0]  (!%p3264_p10), %s202_s10, 8192, %s204_s14, [#allocation9], %s3175_s15, %s3175_s15, %s3176_s16  }
  0x15   : > { %s3177_s27 = smov [#allocation7]   ;;  %s216_s8 = sshll.u32 %s3859_s4, 4  ;;  %s217_s8 = int_to_ptr.hbm [resolvable:$true] %s216_s8 }
  0x16   : > { %s192_s28 = sshll.u32 %s3177_s27, 4  ;;  %s3178_s9 = smov [#allocation10]   ;;  %s193_s28 = int_to_ptr.vmem [resolvable:$true] %s192_s28 }
  0x17   : > { %2876 = dma.hbm_to_vmem [thread:$0]  (!%p3264_p10), %s191_s26, 32, %s193_s28, [#allocation6]  }
  0x18   : > { %s218_s10 = sshll.u32 %s3178_s9, 4  ;;  %s3287_s11 = sadd.s32 1, %s3169_s21   ;;  %s219_s10 = int_to_ptr.vmem [resolvable:$true] %s218_s10 }
  0x19   : > { %2882 = dma.hbm_to_vmem [thread:$0]  (!%p3264_p10), %s217_s8, 64, %s219_s10, [#allocation9]  }
  0x1a   : > { %s30_s12 = sadd.s32 1, %s3165_s20  ;;  %s27_s13 = ssub.s32 %s3169_s21, %s3287_s11 }
  0x1b   : > { %p37_p12 = scmp.ne.s32.totalorder %s3165_s20, %s3161_s19  ;;  %p28_p13 = scmp.eq.s32.totalorder %s27_s13, 0 }
  0x1c   : > { %p38_p0 = scmp.eq.s32.totalorder %s3169_s21, 0  ;;  %p2895_p5 = scmp.lt.s32.totalorder %s3169_s21, 2 }
  0x1d   : > { %p3297_p3 = por %p151_p2, %p37_p12  ;;  %s229_s16 = sand.u32 1, %s3165_s20  }
  0x1e   : > { %s3303_s15 = scalar_select %p28_p13, %s3165_s20, %s30_s12  }
  0x1f   : > { %p39_p7 = por %p38_p0, %p37_p12  ;;  %s2189_s7 = sshll.u32 %s229_s16, 9 }
  0x20   : > { %s2719_s17 = sshll.u32 %s3169_s21, 9  ;;  %s233_s28 = scalar_lea.vmem [#allocation2], %s2189_s7 }
  0x21   : > { %s239_s27 = scalar_lea.hbm %s3855_s0, %s2719_s17  ;;  %s242_s30 = sshll.u32 %s233_s28, 4  ;;  %s243_s30 = int_to_ptr.vmem [resolvable:$true] %s242_s30 }
  0x22   : > { %s240_s6 = sshll.u32 %s239_s27, 4  ;;  %p3310_p2 = pnand %p2895_p5, %p39_p7  ;;  %s241_s6 = int_to_ptr.hbm [resolvable:$true] %s240_s6 }
  0x23   : > { %s230_s9 = scalar_lea.sflag [#allocation3], %s229_s16  ;;  %s3065_s10 = sshra.s32 %s241_s6, 4  ;;  %s3066_s10 = int_to_ptr.hbm [resolvable:$true] %s3065_s10 }
  0x24   : > { %s3067_s12 = scalar_lea.hbm %s3066_s10, 512  ;;  %p3069_p10 = pneg %p3310_p2 }
  0x25   : > { %p3068_p9 = scmp.ne.s32.totalorder %s3066_s10, %s3067_s12  ;;  %s3072_s17 = scalar_lea.hbm %s3855_s0, 1024 }
  0x26   : > { %p3073_p0 = scmp.lt.s32.totalorder %s3066_s10, %s3855_s0  ;;  %p3074_p5 = scmp.lt.s32.totalorder %s3072_s17, %s3067_s12 }
  0x27   : > { %p3070_p12 = pnand %p3069_p10, %p3068_p9 }
  0x28   : > { %p3075_p7 = por %p3074_p5, %p3073_p0 }
  0x29   : > { %p3071_p13 = pneg %p3070_p12 }
  0x2b   : > { %p3076_p11 = pnand %p3075_p7, %p3071_p13 }
  0x2d   : > { %3079 = shalt.err (!%p3076_p11)
}
  0x2e   : > { %s3179_s16 = smov 512   ;;  %s3180_s27 = smov 32  }
  0x2f   : > { %2886 = dma.hbm_to_vmem [thread:$0]  (!%p3310_p2), %s241_s6, 8192, %s243_s30, %s230_s9, %s3179_s16, %s3179_s16, %s3180_s27  }
  0x30   : > { %254 = sbr.rel (%p3256_p8) target bundleno = 754 (0x2f2), region = 40  ;;  %s3327_s28 = sand.u32 (!%p3256_p8), 1, %s3161_s19  }
  0x31   : > { %s2194_s10 = sshll.u32 (!%p3256_p8), %s3327_s28, 9  ;;  %s257_s12 = scalar_lea.sflag (!%p3256_p8), [#allocation3], %s3327_s28 }
  0x32   : > { %s3333_s13 = scalar_lea.vmem (!%p3256_p8), [#allocation2], %s2194_s10 }
  0x35   : > { %3140 = dma.done.wait (%p3243_p4), %s257_s12, 8192  }
  0x36   : > { %3142 = vsyncadd (%p3243_p4), %s257_s12, 4294959104 }
  0x37   : > { %3144 = dma.done.wait (%p44_p1), [#allocation6], 8224  }
  0x38   : > { %3146 = vsyncadd (%p44_p1), [#allocation6], 4294959072 }
  0x39   : > { %3148 = dma.done.wait (%p44_p1), [#allocation9], 8256  }
  0x3a   : > { %3150 = vsyncadd (%p44_p1), [#allocation9], 4294959040  ;;  %v2258_v0 = vld [vmem:[#allocation5 + $0x70] sm:$0xf]  ;;  %v2735_v1 = vld [vmem:[#allocation5 + $0x74] sm:$0xf0] }
  0x3b   : > { %v2322_v2 = vld [vmem:[#allocation5 + $0xf0] sm:$0xf]  ;;  %v2259_v3 = vor.u32 %v2735_v1, %v2258_v0  ;;  %v2751_v4 = vld [vmem:[#allocation5 + $0xf4] sm:$0xf0]  ;;  %v2250_v11 = vld [vmem:[#allocation5 + $0x60] sm:$0xf] }
  0x3c   : > { %v2386_v5 = vld [vmem:[#allocation5 + $0x170] sm:$0xf]  ;;  %v2767_v6 = vld [vmem:[#allocation5 + $0x174] sm:$0xf0]  ;;  %v2323_v7 = vor.u32 %v2751_v4, %v2322_v2  ;;  %v2733_v13 = vld [vmem:[#allocation5 + $0x64] sm:$0xf0] }
  0x3d   : > { %v2387_v8 = vor.u32 %v2767_v6, %v2386_v5  ;;  %v2450_v9 = vld [vmem:[#allocation5 + $0x1f0] sm:$0xf]  ;;  %v2783_v10 = vld [vmem:[#allocation5 + $0x1f4] sm:$0xf0]  ;;  %796 = vmatpush.bf16.msra.mxu0 %v2259_v3  ;;  %v2314_v14 = vld [vmem:[#allocation5 + $0xe0] sm:$0xf]  ;;  %v2251_v16 = vor.u32 %v2733_v13, %v2250_v11 }
  0x3e   : > { %v2451_v12 = vor.u32 %v2783_v10, %v2450_v9  ;;  %v2749_v15 = vld [vmem:[#allocation5 + $0xe4] sm:$0xf0]  ;;  %845 = vmatpush.bf16.msra.mxu1 %v2323_v7  ;;  %v2378_v18 = vld [vmem:[#allocation5 + $0x160] sm:$0xf]  ;;  %v2242_v23 = vld [vmem:[#allocation5 + $0x50] sm:$0xf] }
  0x3f   : > { %894 = vmatpush.bf16.msra.mxu2 %v2387_v8  ;;  %v2315_v17 = vor.u32 %v2749_v15, %v2314_v14  ;;  %v2765_v19 = vld [vmem:[#allocation5 + $0x164] sm:$0xf0]  ;;  %v2442_v20 = vld [vmem:[#allocation5 + $0x1e0] sm:$0xf]  ;;  %v2731_v24 = vld [vmem:[#allocation5 + $0x54] sm:$0xf0] }
  0x40   : > { %943 = vmatpush.bf16.msra.mxu3 %v2451_v12  ;;  %v2379_v21 = vor.u32 %v2765_v19, %v2378_v18  ;;  %v2781_v22 = vld [vmem:[#allocation5 + $0x1e4] sm:$0xf0]  ;;  %v2306_v26 = vld [vmem:[#allocation5 + $0xd0] sm:$0xf]  ;;  %v2747_v27 = vld [vmem:[#allocation5 + $0xd4] sm:$0xf0]  ;;  %v2243_v29 = vor.u32 %v2731_v24, %v2242_v23 }
  0x41   : > { %v2443_v25 = vor.u32 %v2781_v22, %v2442_v20  ;;  %v2370_v28 = vld [vmem:[#allocation5 + $0x150] sm:$0xf]  ;;  %797 = vmatpush.bf16.msra.mxu0 %v2251_v16  ;;  %v2763_v30 = vld [vmem:[#allocation5 + $0x154] sm:$0xf0]  ;;  %v2307_v33 = vor.u32 %v2747_v27, %v2306_v26  ;;  %v2234_v35 = vld [vmem:[#allocation5 + $0x40] sm:$0xf] }
  0x42   : > { %v2434_v31 = vld [vmem:[#allocation5 + $0x1d0] sm:$0xf]  ;;  %v2779_v32 = vld [vmem:[#allocation5 + $0x1d4] sm:$0xf0]  ;;  %846 = vmatpush.bf16.msra.mxu1 %v2315_v17  ;;  %v2371_v34 = vor.u32 %v2763_v30, %v2370_v28  ;;  %v2729_v36 = vld [vmem:[#allocation5 + $0x44] sm:$0xf0] }
  0x43   : > { %895 = vmatpush.bf16.msra.mxu2 %v2379_v21  ;;  %v2298_v37 = vld [vmem:[#allocation5 + $0xc0] sm:$0xf]  ;;  %v2435_v38 = vor.u32 %v2779_v32, %v2434_v31  ;;  %v2745_v39 = vld [vmem:[#allocation5 + $0xc4] sm:$0xf0]  ;;  %v2235_v44 = vor.u32 %v2729_v36, %v2234_v35  ;;  %v2226_v47 = vld [vmem:[#allocation5 + $0x30] sm:$0xf] }
  0x44   : > { %944 = vmatpush.bf16.msra.mxu3 %v2443_v25  ;;  %v2362_v40 = vld [vmem:[#allocation5 + $0x140] sm:$0xf]  ;;  %v2761_v41 = vld [vmem:[#allocation5 + $0x144] sm:$0xf0]  ;;  %v2299_v45 = vor.u32 %v2745_v39, %v2298_v37  ;;  %v2727_v48 = vld [vmem:[#allocation5 + $0x34] sm:$0xf0] }
  0x45   : > { %v2426_v42 = vld [vmem:[#allocation5 + $0x1c0] sm:$0xf]  ;;  %v2777_v43 = vld [vmem:[#allocation5 + $0x1c4] sm:$0xf0]  ;;  %798 = vmatpush.bf16.msra.mxu0 %v2243_v29  ;;  %v2363_v46 = vor.u32 %v2761_v41, %v2362_v40  ;;  %v2290_v49 = vld [vmem:[#allocation5 + $0xb0] sm:$0xf]  ;;  %v2227_v56 = vor.u32 %v2727_v48, %v2226_v47 }
  0x46   : > { %847 = vmatpush.bf16.msra.mxu1 %v2307_v33  ;;  %v2427_v50 = vor.u32 %v2777_v43, %v2426_v42  ;;  %v2743_v51 = vld [vmem:[#allocation5 + $0xb4] sm:$0xf0]  ;;  %v2354_v52 = vld [vmem:[#allocation5 + $0x130] sm:$0xf]  ;;  %v2218_v59 = vld [vmem:[#allocation5 + $0x20] sm:$0xf] }
  0x47   : > { %896 = vmatpush.bf16.msra.mxu2 %v2371_v34  ;;  %v2759_v53 = vld [vmem:[#allocation5 + $0x134] sm:$0xf0]  ;;  %v2418_v54 = vld [vmem:[#allocation5 + $0x1b0] sm:$0xf]  ;;  %v2291_v57 = vor.u32 %v2743_v51, %v2290_v49  ;;  %v2725_v60 = vld [vmem:[#allocation5 + $0x24] sm:$0xf0] }
  0x48   : > { %945 = vmatpush.bf16.msra.mxu3 %v2435_v38  ;;  %v2775_v55 = vld [vmem:[#allocation5 + $0x1b4] sm:$0xf0]  ;;  %v2355_v58 = vor.u32 %v2759_v53, %v2354_v52  ;;  %v2282_v61 = vld [vmem:[#allocation5 + $0xa0] sm:$0xf]  ;;  %v2741_v63 = vld [vmem:[#allocation5 + $0xa4] sm:$0xf0]  ;;  %v2219_v4 = vor.u32 %v2725_v60, %v2218_v59 }
  0x49   : > { %799 = vmatpush.bf16.msra.mxu0 %v2235_v44  ;;  %v2419_v62 = vor.u32 %v2775_v55, %v2418_v54  ;;  %v2346_v0 = vld [vmem:[#allocation5 + $0x120] sm:$0xf]  ;;  %v2757_v1 = vld [vmem:[#allocation5 + $0x124] sm:$0xf0]  ;;  %v2283_v5 = vor.u32 %v2741_v63, %v2282_v61  ;;  %v2210_v7 = vld [vmem:[#allocation5 + $0x10] sm:$0xf] }
  0x4a   : > { %848 = vmatpush.bf16.msra.mxu1 %v2299_v45  ;;  %v2410_v2 = vld [vmem:[#allocation5 + $0x1a0] sm:$0xf]  ;;  %v2773_v3 = vld [vmem:[#allocation5 + $0x1a4] sm:$0xf0]  ;;  %v2347_v6 = vor.u32 %v2757_v1, %v2346_v0  ;;  %v2723_v8 = vld [vmem:[#allocation5 + $0x14] sm:$0xf0] }
  0x4b   : > { %897 = vmatpush.bf16.msra.mxu2 %v2363_v46  ;;  %v2274_v9 = vld [vmem:[#allocation5 + $0x90] sm:$0xf]  ;;  %v2411_v10 = vor.u32 %v2773_v3, %v2410_v2  ;;  %v2739_v11 = vld [vmem:[#allocation5 + $0x94] sm:$0xf0]  ;;  %v2202_v16 = vld [vmem:[#allocation5] sm:$0xf]  ;;  %v2211_v17 = vor.u32 %v2723_v8, %v2210_v7 }
  0x4c   : > { %946 = vmatpush.bf16.msra.mxu3 %v2427_v50  ;;  %v2338_v12 = vld [vmem:[#allocation5 + $0x110] sm:$0xf]  ;;  %v2755_v13 = vld [vmem:[#allocation5 + $0x114] sm:$0xf0]  ;;  %v2721_v18 = vld [vmem:[#allocation5 + $0x4] sm:$0xf0]  ;;  %v2275_v21 = vor.u32 %v2739_v11, %v2274_v9 }
  0x4d   : > { %800 = vmatpush.bf16.msra.mxu0 %v2227_v56  ;;  %v2402_v14 = vld [vmem:[#allocation5 + $0x190] sm:$0xf]  ;;  %v2771_v15 = vld [vmem:[#allocation5 + $0x194] sm:$0xf0]  ;;  %v2266_v19 = vld [vmem:[#allocation5 + $0x80] sm:$0xf]  ;;  %v2339_v22 = vor.u32 %v2755_v13, %v2338_v12  ;;  %v2203_v34 = vor.u32 %v2721_v18, %v2202_v16 }
  0x4e   : > { %849 = vmatpush.bf16.msra.mxu1 %v2291_v57  ;;  %v2737_v20 = vld [vmem:[#allocation5 + $0x84] sm:$0xf0]  ;;  %v2330_v23 = vld [vmem:[#allocation5 + $0x100] sm:$0xf]  ;;  %v2403_v26 = vor.u32 %v2771_v15, %v2402_v14  ;;  %v2766_v32 = vld [vmem:[#allocation5 + $0x174] sm:$0xf] }
  0x4f   : > { %898 = vmatpush.bf16.msra.mxu2 %v2355_v58  ;;  %v2753_v24 = vld [vmem:[#allocation5 + $0x104] sm:$0xf0]  ;;  %v2394_v25 = vld [vmem:[#allocation5 + $0x180] sm:$0xf]  ;;  %v2388_v33 = vld [vmem:[#allocation5 + $0x178] sm:$0xf0]  ;;  %v2267_v38 = vor.u32 %v2737_v20, %v2266_v19 }
  0x50   : > { %947 = vmatpush.bf16.msra.mxu3 %v2419_v62  ;;  %v2769_v27 = vld [vmem:[#allocation5 + $0x184] sm:$0xf0]  ;;  %v310_v28 = vld [vmem:[%s3333_s13] sm:$0xff]  ;;  %v312_v35 = vld [vmem:[%s3333_s13 + $0x10] sm:$0xff]  ;;  %v2331_v39 = vor.u32 %v2753_v24, %v2330_v23  ;;  %v2391_v44 = vor.u32 %v2766_v32, %v2388_v33  ;;  %s3658_s24 = scalar_lea.vmem [#allocation11], %s2194_s10  ;;  %s2849_s29 = sshll.u32 %s3234_s22, 9 }
  0x51   : > { %801 = vmatpush.bf16.msra.mxu0 %v2219_v4  ;;  %v314_v29 = vld [vmem:[%s3333_s13 + $0x20] sm:$0xff]  ;;  %v311_v30 = vld [vmem:[%s3333_s13 + $0x8] sm:$0xff]  ;;  %v2782_v36 = vld [vmem:[#allocation5 + $0x1f4] sm:$0xf]  ;;  %v2395_v43 = vor.u32 %v2769_v27, %v2394_v25  ;;  %s2067_s8 = scalar_lea.hbm %s3860_s5, %s2849_s29  ;;  %s2068_s9 = sshll.u32 %s3658_s24, 4  ;;  %s2069_s9 = int_to_ptr.vmem [resolvable:$true] %s2068_s9 }
  0x52   : > { %850 = vmatpush.bf16.msra.mxu1 %v2283_v5  ;;  %v315_v31 = vld [vmem:[%s3333_s13 + $0x28] sm:$0xff]  ;;  %v2452_v37 = vld [vmem:[#allocation5 + $0x1f8] sm:$0xf0]  ;;  %v316_v40 = vld [vmem:[%s3333_s13 + $0x30] sm:$0xff]  ;;  %v3355_v48 = vpack.c.bf16 %v314_v29, %v310_v28  ;;  %s2070_s7 = sshll.u32 %s2067_s8, 4  ;;  %s2055_s22 = scalar_lea.sflag [#allocation4], %s3327_s28  ;;  %s2071_s7 = int_to_ptr.hbm [resolvable:$true] %s2070_s7 }
  0x53   : > { %899 = vmatpush.bf16.msra.mxu2 %v2347_v6  ;;  %v313_v41 = vld [vmem:[%s3333_s13 + $0x18] sm:$0xff]  ;;  %v2734_v45 = vld [vmem:[#allocation5 + $0x74] sm:$0xf]  ;;  %v2455_v49 = vor.u32 %v2782_v36, %v2452_v37  ;;  %v2764_v51 = vld [vmem:[#allocation5 + $0x164] sm:$0xf]  ;;  %v3357_v53 = vpack.c.bf16 %v315_v31, %v311_v30  ;;  %v3359_v54 = vpack.c.bf16 %v316_v40, %v312_v35  ;;  %s3109_s17 = sshra.s32 %s2071_s7, 4  ;;  %s3110_s17 = int_to_ptr.hbm [resolvable:$true] %s3109_s17 }
  0x54   : > { %948 = vmatpush.bf16.msra.mxu3 %v2411_v10  ;;  %v317_v42 = vld [vmem:[%s3333_s13 + $0x38] sm:$0xff]  ;;  %v2750_v47 = vld [vmem:[#allocation5 + $0xf4] sm:$0xf]  ;;  %v2380_v52 = vld [vmem:[#allocation5 + $0x168] sm:$0xf0]  ;;  %s3111_s23 = scalar_lea.hbm %s3110_s17, 512  ;;  %p3116_p11 = scmp.lt.s32.totalorder %s3110_s17, %s3860_s5 }
  0x55   : > { %802 = vmatpush.bf16.msra.mxu0 %v2211_v17  ;;  %v2260_v46 = vld [vmem:[#allocation5 + $0x78] sm:$0xf0]  ;;  %v2780_v55 = vld [vmem:[#allocation5 + $0x1e4] sm:$0xf]  ;;  %v2444_v56 = vld [vmem:[#allocation5 + $0x1e8] sm:$0xf0]  ;;  %v3361_v57 = vpack.c.bf16 %v317_v42, %v313_v41  ;;  %v2383_v60 = vor.u32 %v2764_v51, %v2380_v52  ;;  %p3112_p1 = scmp.ne.s32.totalorder %s3110_s17, %s3111_s23 }
  0x56   : > { %851 = vmatpush.bf16.msra.mxu1 %v2275_v21  ;;  %v2324_v50 = vld [vmem:[#allocation5 + $0xf8] sm:$0xf0]  ;;  %v2263_v58 = vor.u32 %v2734_v45, %v2260_v46  ;;  %v2732_v61 = vld [vmem:[#allocation5 + $0x64] sm:$0xf]  ;;  %v2252_v62 = vld [vmem:[#allocation5 + $0x68] sm:$0xf0]  ;;  %v2447_v63 = vor.u32 %v2780_v55, %v2444_v56 }
  0x57   : > { %900 = vmatpush.bf16.msra.mxu2 %v2339_v22  ;;  %v2327_v59 = vor.u32 %v2750_v47, %v2324_v50  ;;  %v2748_v0 = vld [vmem:[#allocation5 + $0xe4] sm:$0xf]  ;;  %v2316_v1 = vld [vmem:[#allocation5 + $0xe8] sm:$0xf0]  ;;  %v2255_v2 = vor.u32 %v2732_v61, %v2252_v62  ;;  %v2762_v3 = vld [vmem:[#allocation5 + $0x154] sm:$0xf]  ;;  %p3113_p4 = pnand %p3112_p1, %p3297_p3 }
  0x58   : > { %949 = vmatpush.bf16.msra.mxu3 %v2403_v26  ;;  %v2372_v4 = vld [vmem:[#allocation5 + $0x158] sm:$0xf0]  ;;  %v2730_v5 = vld [vmem:[#allocation5 + $0x54] sm:$0xf]  ;;  %v2319_v6 = vor.u32 %v2748_v0, %v2316_v1  ;;  %v318_v16 = vld [vmem:[%s3333_s13 + $0x40] sm:$0xff]  ;;  %s3115_s27 = scalar_lea.hbm %s3860_s5, 1024 }
  0x59   : > { %803 = vmatpush.bf16.msra.mxu0 %v2203_v34  ;;  %v2375_v7 = vor.u32 %v2762_v3, %v2372_v4  ;;  %v2244_v8 = vld [vmem:[#allocation5 + $0x58] sm:$0xf0]  ;;  %v2778_v9 = vld [vmem:[#allocation5 + $0x1d4] sm:$0xf]  ;;  %v322_v17 = vld [vmem:[%s3333_s13 + $0x60] sm:$0xff]  ;;  %p3114_p8 = pneg %p3113_p4  ;;  %p3117_p2 = scmp.lt.s32.totalorder %s3115_s27, %s3111_s23 }
  0x5a   : > { %852 = vmatpush.bf16.msra.mxu1 %v2267_v38  ;;  %v2436_v10 = vld [vmem:[#allocation5 + $0x1d8] sm:$0xf0]  ;;  %v2746_v12 = vld [vmem:[#allocation5 + $0xd4] sm:$0xf]  ;;  %v2247_v14 = vor.u32 %v2730_v5, %v2244_v8  ;;  %v319_v18 = vld [vmem:[%s3333_s13 + $0x48] sm:$0xff]  ;;  %v3375_v24 = vpack.c.bf16 %v322_v17, %v318_v16 }
  0x5b   : > { %901 = vmatpush.bf16.msra.mxu2 %v2331_v39  ;;  %v2439_v11 = vor.u32 %v2778_v9, %v2436_v10  ;;  %v2308_v13 = vld [vmem:[#allocation5 + $0xd8] sm:$0xf0]  ;;  %v323_v19 = vld [vmem:[%s3333_s13 + $0x68] sm:$0xff]  ;;  %v320_v20 = vld [vmem:[%s3333_s13 + $0x50] sm:$0xff]  ;;  %p3118_p9 = por %p3117_p2, %p3116_p11 }
  0x5c   : > { %950 = vmatpush.bf16.msra.mxu3 %v2395_v43  ;;  %804 = vmatmul.bf16.vlgmr.msra.gmra.mxu0 %v3355_v48  ;;  %v2311_v15 = vor.u32 %v2746_v12, %v2308_v13  ;;  %v324_v21 = vld [vmem:[%s3333_s13 + $0x70] sm:$0xff]  ;;  %v321_v22 = vld [vmem:[%s3333_s13 + $0x58] sm:$0xff]  ;;  %v3377_v25 = vpack.c.bf16 %v323_v19, %v319_v18  ;;  %v2760_v28 = vld [vmem:[#allocation5 + $0x144] sm:$0xf] }
  0x5d   : > { %853 = vmatmul.bf16.vlgmr.msra.gmra.mxu1 %v3357_v53  ;;  %992 = vmatpush.bf16.msrb.mxu0 %v2263_v58  ;;  %v325_v23 = vld [vmem:[%s3333_s13 + $0x78] sm:$0xff]  ;;  %v3379_v26 = vpack.c.bf16 %v324_v21, %v320_v20  ;;  %v2364_v29 = vld [vmem:[#allocation5 + $0x148] sm:$0xf0]  ;;  %v2728_v30 = vld [vmem:[#allocation5 + $0x44] sm:$0xf]  ;;  %p3119_p10 = pnand %p3118_p9, %p3114_p8 }
  0x5e   : > { %902 = vmatmul.bf16.vlgmr.msra.gmra.mxu2 %v3359_v54  ;;  %1041 = vmatpush.bf16.msrb.mxu1 %v2327_v59  ;;  %v3381_v27 = vpack.c.bf16 %v325_v23, %v321_v22  ;;  %v2367_v31 = vor.u32 %v2760_v28, %v2364_v29  ;;  %v2236_v32 = vld [vmem:[#allocation5 + $0x48] sm:$0xf0]  ;;  %v2776_v33 = vld [vmem:[#allocation5 + $0x1c4] sm:$0xf]  ;;  %v332_v45 = vld [vmem:[%s3333_s13 + $0xb0] sm:$0xff] }
  0x5f   : > { %1090 = vmatpush.bf16.msrb.mxu2 %v2391_v44  ;;  %951 = vmatmul.bf16.vlgmr.msra.gmra.mxu3 %v3361_v57  ;;  %v2428_v34 = vld [vmem:[#allocation5 + $0x1c8] sm:$0xf0]  ;;  %v2239_v35 = vor.u32 %v2728_v30, %v2236_v32  ;;  %v2744_v37 = vld [vmem:[#allocation5 + $0xc4] sm:$0xf]  ;;  %v328_v44 = vld [vmem:[%s3333_s13 + $0x90] sm:$0xff] }
  0x60   : > { %1139 = vmatpush.bf16.msrb.mxu3 %v2455_v49  ;;  %v2431_v36 = vor.u32 %v2776_v33, %v2428_v34  ;;  %v2300_v38 = vld [vmem:[#allocation5 + $0xc8] sm:$0xf0]  ;;  %v326_v40 = vld [vmem:[%s3333_s13 + $0x80] sm:$0xff]  ;;  %v329_v46 = vld [vmem:[%s3333_s13 + $0x98] sm:$0xff]  ;;  %v3399_v51 = vpack.c.bf16 %v332_v45, %v328_v44 }
  0x61   : > { %993 = vmatpush.bf16.msrb.mxu0 %v2255_v2  ;;  %v2303_v39 = vor.u32 %v2744_v37, %v2300_v38  ;;  %v330_v41 = vld [vmem:[%s3333_s13 + $0xa0] sm:$0xff]  ;;  %v327_v42 = vld [vmem:[%s3333_s13 + $0x88] sm:$0xff]  ;;  %v333_v47 = vld [vmem:[%s3333_s13 + $0xb8] sm:$0xff] }
  0x62   : > { %1042 = vmatpush.bf16.msrb.mxu1 %v2319_v6  ;;  %v331_v43 = vld [vmem:[%s3333_s13 + $0xa8] sm:$0xff]  ;;  %v3395_v49 = vpack.c.bf16 %v330_v41, %v326_v40  ;;  %v3401_v52 = vpack.c.bf16 %v333_v47, %v329_v46  ;;  %v2758_v55 = vld [vmem:[#allocation5 + $0x134] sm:$0xf]  ;;  %v2356_v56 = vld [vmem:[#allocation5 + $0x138] sm:$0xf0] }
  0x63   : > { %1091 = vmatpush.bf16.msrb.mxu2 %v2383_v60  ;;  %v3397_v50 = vpack.c.bf16 %v331_v43, %v327_v42  ;;  %v2726_v58 = vld [vmem:[#allocation5 + $0x34] sm:$0xf]  ;;  %v2359_v59 = vor.u32 %v2758_v55, %v2356_v56  ;;  %v2228_v60 = vld [vmem:[#allocation5 + $0x38] sm:$0xf0]  ;;  %v334_v4 = vld [vmem:[%s3333_s13 + $0xc0] sm:$0xff] }
  0x64   : > { %1140 = vmatpush.bf16.msrb.mxu3 %v2447_v63  ;;  %v2774_v61 = vld [vmem:[#allocation5 + $0x1b4] sm:$0xf]  ;;  %v2420_v62 = vld [vmem:[#allocation5 + $0x1b8] sm:$0xf0]  ;;  %v2231_v63 = vor.u32 %v2726_v58, %v2228_v60  ;;  %v338_v5 = vld [vmem:[%s3333_s13 + $0xe0] sm:$0xff] }
  0x65   : > { %994 = vmatpush.bf16.msrb.mxu0 %v2247_v14  ;;  %v2423_v0 = vor.u32 %v2774_v61, %v2420_v62  ;;  %v2742_v1 = vld [vmem:[#allocation5 + $0xb4] sm:$0xf]  ;;  %v2292_v2 = vld [vmem:[#allocation5 + $0xb8] sm:$0xf0]  ;;  %v335_v6 = vld [vmem:[%s3333_s13 + $0xc8] sm:$0xff]  ;;  %v3415_v12 = vpack.c.bf16 %v338_v5, %v334_v4 }
  0x66   : > { %1043 = vmatpush.bf16.msrb.mxu1 %v2311_v15  ;;  %v2295_v3 = vor.u32 %v2742_v1, %v2292_v2  ;;  %v336_v8 = vld [vmem:[%s3333_s13 + $0xd0] sm:$0xff]  ;;  %v337_v10 = vld [vmem:[%s3333_s13 + $0xd8] sm:$0xff]  ;;  %v2756_v16 = vld [vmem:[#allocation5 + $0x124] sm:$0xf] }
  0x67   : > { %1092 = vmatpush.bf16.msrb.mxu2 %v2375_v7  ;;  %v339_v7 = vld [vmem:[%s3333_s13 + $0xe8] sm:$0xff]  ;;  %v340_v9 = vld [vmem:[%s3333_s13 + $0xf0] sm:$0xff]  ;;  %v2724_v18 = vld [vmem:[#allocation5 + $0x24] sm:$0xf] }
  0x68   : > { %1141 = vmatpush.bf16.msrb.mxu3 %v2439_v11  ;;  %v341_v11 = vld [vmem:[%s3333_s13 + $0xf8] sm:$0xff]  ;;  %v3417_v13 = vpack.c.bf16 %v339_v7, %v335_v6  ;;  %v3419_v14 = vpack.c.bf16 %v340_v9, %v336_v8  ;;  %v2348_v17 = vld [vmem:[#allocation5 + $0x128] sm:$0xf0]  ;;  %v2772_v21 = vld [vmem:[#allocation5 + $0x1a4] sm:$0xf] }
  0x69   : > { %995 = vmatpush.bf16.msrb.mxu0 %v2239_v35  ;;  %v3421_v15 = vpack.c.bf16 %v341_v11, %v337_v10  ;;  %v2351_v19 = vor.u32 %v2756_v16, %v2348_v17  ;;  %v2220_v20 = vld [vmem:[#allocation5 + $0x28] sm:$0xf0]  ;;  %v2740_v29 = vld [vmem:[#allocation5 + $0xa4] sm:$0xf]  ;;  %v348_v37 = vld [vmem:[%s3333_s13 + $0x130] sm:$0xff] }
  0x6a   : > { %1044 = vmatpush.bf16.msrb.mxu1 %v2303_v39  ;;  %v2412_v22 = vld [vmem:[#allocation5 + $0x1a8] sm:$0xf0]  ;;  %v2223_v23 = vor.u32 %v2724_v18, %v2220_v20  ;;  %v342_v32 = vld [vmem:[%s3333_s13 + $0x100] sm:$0xff]  ;;  %v345_v38 = vld [vmem:[%s3333_s13 + $0x118] sm:$0xff] }
  0x6b   : > { %1093 = vmatpush.bf16.msrb.mxu2 %v2367_v31  ;;  %v2415_v28 = vor.u32 %v2772_v21, %v2412_v22  ;;  %v2284_v30 = vld [vmem:[#allocation5 + $0xa8] sm:$0xf0]  ;;  %v346_v33 = vld [vmem:[%s3333_s13 + $0x120] sm:$0xff]  ;;  %v349_v39 = vld [vmem:[%s3333_s13 + $0x138] sm:$0xff] }
  0x6c   : > { %809 = vmatmul.bf16.gmra.mxu0 %v3375_v24  ;;  %1142 = vmatpush.bf16.msrb.mxu3 %v2431_v36  ;;  %v2287_v31 = vor.u32 %v2740_v29, %v2284_v30  ;;  %v343_v34 = vld [vmem:[%s3333_s13 + $0x108] sm:$0xff]  ;;  %v344_v36 = vld [vmem:[%s3333_s13 + $0x110] sm:$0xff]  ;;  %v3435_v40 = vpack.c.bf16 %v346_v33, %v342_v32  ;;  %v3441_v43 = vpack.c.bf16 %v349_v39, %v345_v38  ;;  %v2340_v45 = vld [vmem:[#allocation5 + $0x118] sm:$0xf0] }
  0x6d   : > { %858 = vmatmul.bf16.gmra.mxu1 %v3377_v25  ;;  %996 = vmatpush.bf16.msrb.mxu0 %v2231_v63  ;;  %v347_v35 = vld [vmem:[%s3333_s13 + $0x128] sm:$0xff]  ;;  %v3439_v42 = vpack.c.bf16 %v348_v37, %v344_v36  ;;  %v2754_v44 = vld [vmem:[#allocation5 + $0x114] sm:$0xf]  ;;  %v2212_v55 = vld [vmem:[#allocation5 + $0x18] sm:$0xf0] }
  0x6e   : > { %907 = vmatmul.bf16.gmra.mxu2 %v3379_v26  ;;  %1045 = vmatpush.bf16.msrb.mxu1 %v2295_v3  ;;  %v3437_v41 = vpack.c.bf16 %v347_v35, %v343_v34  ;;  %v2722_v46 = vld [vmem:[#allocation5 + $0x14] sm:$0xf]  ;;  %v2343_v47 = vor.u32 %v2754_v44, %v2340_v45  ;;  %v2404_v58 = vld [vmem:[#allocation5 + $0x198] sm:$0xf0]  ;;  %v354_v1 = vld [vmem:[%s3333_s13 + $0x160] sm:$0xff] }
  0x6f   : > { %956 = vmatmul.bf16.gmra.mxu3 %v3381_v27  ;;  %1094 = vmatpush.bf16.msrb.mxu2 %v2359_v59  ;;  %v2770_v56 = vld [vmem:[#allocation5 + $0x194] sm:$0xf]  ;;  %v2215_v59 = vor.u32 %v2722_v46, %v2212_v55  ;;  %v2276_v62 = vld [vmem:[#allocation5 + $0x98] sm:$0xf0]  ;;  %v351_v2 = vld [vmem:[%s3333_s13 + $0x148] sm:$0xff] }
  0x70   : > { %1143 = vmatpush.bf16.msrb.mxu3 %v2423_v0  ;;  %v2407_v60 = vor.u32 %v2770_v56, %v2404_v58  ;;  %v2738_v61 = vld [vmem:[#allocation5 + $0x94] sm:$0xf]  ;;  %v350_v0 = vld [vmem:[%s3333_s13 + $0x140] sm:$0xff]  ;;  %v355_v3 = vld [vmem:[%s3333_s13 + $0x168] sm:$0xff] }
  0x71   : > { %997 = vmatpush.bf16.msrb.mxu0 %v2223_v23  ;;  %v2279_v63 = vor.u32 %v2738_v61, %v2276_v62  ;;  %v352_v4 = vld [vmem:[%s3333_s13 + $0x150] sm:$0xff]  ;;  %v353_v6 = vld [vmem:[%s3333_s13 + $0x158] sm:$0xff]  ;;  %v3455_v8 = vpack.c.bf16 %v354_v1, %v350_v0  ;;  %v3457_v9 = vpack.c.bf16 %v355_v3, %v351_v2  ;;  %v2752_v16 = vld [vmem:[#allocation5 + $0x104] sm:$0xf] }
  0x72   : > { %1046 = vmatpush.bf16.msrb.mxu1 %v2287_v31  ;;  %v356_v5 = vld [vmem:[%s3333_s13 + $0x170] sm:$0xff]  ;;  %v357_v7 = vld [vmem:[%s3333_s13 + $0x178] sm:$0xff]  ;;  %v2332_v17 = vld [vmem:[#allocation5 + $0x108] sm:$0xf0] }
  0x73   : > { %1095 = vmatpush.bf16.msrb.mxu2 %v2351_v19  ;;  %v3459_v10 = vpack.c.bf16 %v356_v5, %v352_v4  ;;  %v3461_v11 = vpack.c.bf16 %v357_v7, %v353_v6  ;;  %v2720_v18 = vld [vmem:[#allocation5 + $0x4] sm:$0xf]  ;;  %v2335_v19 = vor.u32 %v2752_v16, %v2332_v17  ;;  %v2204_v20 = vld [vmem:[#allocation5 + $0x8] sm:$0xf0]  ;;  %v360_v36 = vld [vmem:[%s3333_s13 + $0x190] sm:$0xff] }
  0x74   : > { %1144 = vmatpush.bf16.msrb.mxu3 %v2415_v28  ;;  %v2768_v21 = vld [vmem:[#allocation5 + $0x184] sm:$0xf]  ;;  %v2396_v22 = vld [vmem:[#allocation5 + $0x188] sm:$0xf0]  ;;  %v2207_v23 = vor.u32 %v2720_v18, %v2204_v20  ;;  %v364_v37 = vld [vmem:[%s3333_s13 + $0x1b0] sm:$0xff] }
  0x75   : > { %998 = vmatpush.bf16.msrb.mxu0 %v2215_v59  ;;  %v2399_v28 = vor.u32 %v2768_v21, %v2396_v22  ;;  %v2736_v29 = vld [vmem:[#allocation5 + $0x84] sm:$0xf]  ;;  %v2268_v30 = vld [vmem:[#allocation5 + $0x88] sm:$0xf0]  ;;  %v361_v38 = vld [vmem:[%s3333_s13 + $0x198] sm:$0xff]  ;;  %v3479_v46 = vpack.c.bf16 %v364_v37, %v360_v36 }
  0x76   : > { %1047 = vmatpush.bf16.msrb.mxu1 %v2279_v63  ;;  %v2271_v31 = vor.u32 %v2736_v29, %v2268_v30  ;;  %v358_v32 = vld [vmem:[%s3333_s13 + $0x180] sm:$0xff]  ;;  %v359_v34 = vld [vmem:[%s3333_s13 + $0x188] sm:$0xff]  ;;  %v365_v39 = vld [vmem:[%s3333_s13 + $0x1b8] sm:$0xff] }
  0x77   : > { %1096 = vmatpush.bf16.msrb.mxu2 %v2343_v47  ;;  %v362_v33 = vld [vmem:[%s3333_s13 + $0x1a0] sm:$0xff]  ;;  %v363_v35 = vld [vmem:[%s3333_s13 + $0x1a8] sm:$0xff]  ;;  %v3481_v47 = vpack.c.bf16 %v365_v39, %v361_v38  ;;  %v372_v61 = vld [vmem:[%s3333_s13 + $0x1f0] sm:$0xff] }
  0x78   : > { %1145 = vmatpush.bf16.msrb.mxu3 %v2407_v60  ;;  %v3475_v44 = vpack.c.bf16 %v362_v33, %v358_v32  ;;  %v3477_v45 = vpack.c.bf16 %v363_v35, %v359_v34  ;;  %v366_v55 = vld [vmem:[%s3333_s13 + $0x1c0] sm:$0xff]  ;;  %v367_v58 = vld [vmem:[%s3333_s13 + $0x1c8] sm:$0xff]  ;;  %v368_v60 = vld [vmem:[%s3333_s13 + $0x1d0] sm:$0xff] }
  0x79   : > { %999 = vmatpush.bf16.msrb.mxu0 %v2207_v23  ;;  %v370_v56 = vld [vmem:[%s3333_s13 + $0x1e0] sm:$0xff]  ;;  %v371_v59 = vld [vmem:[%s3333_s13 + $0x1e8] sm:$0xff]  ;;  %v369_v62 = vld [vmem:[%s3333_s13 + $0x1d8] sm:$0xff]  ;;  %v3499_v2 = vpack.c.bf16 %v372_v61, %v368_v60 }
  0x7a   : > { %1048 = vmatpush.bf16.msrb.mxu1 %v2271_v31  ;;  %v373_v63 = vld [vmem:[%s3333_s13 + $0x1f8] sm:$0xff]  ;;  %v3495_v0 = vpack.c.bf16 %v370_v56, %v366_v55  ;;  %v3497_v1 = vpack.c.bf16 %v371_v59, %v367_v58  ;;  %v2812_v4 = vld [vmem:[#allocation8 + $0xe4] sm:$0xf]  ;;  %v3507_v18 = vld [vmem:[#allocation7] sm:$0x3] }
  0x7b   : > { %1097 = vmatpush.bf16.msrb.mxu2 %v2335_v19  ;;  %v3501_v3 = vpack.c.bf16 %v373_v63, %v369_v62  ;;  %v2572_v5 = vld [vmem:[#allocation8 + $0xf0] sm:$0xf0]  ;;  %v2844_v6 = vld [vmem:[#allocation8 + $0x1e4] sm:$0xf]  ;;  %v2570_v19 = vld [vmem:[#allocation8 + $0xe0] sm:$0xf] }
  0x7c   : > { %814 = vmatmul.bf16.gmra.mxu0 %v3395_v49  ;;  %1146 = vmatpush.bf16.msrb.mxu3 %v2399_v28  ;;  %v2575_v7 = vor.u32 %v2812_v4, %v2572_v5  ;;  %v2700_v16 = vld [vmem:[#allocation8 + $0x1f0] sm:$0xf0]  ;;  %v2814_v20 = vld [vmem:[#allocation8 + $0xec] sm:$0xf0]  ;;  %v2698_v21 = vld [vmem:[#allocation8 + $0x1e0] sm:$0xf] }
  0x7d   : > { %863 = vmatmul.bf16.gmra.mxu1 %v3397_v50  ;;  %v2703_v17 = vor.u32 %v2844_v6, %v2700_v16  ;;  %v2571_v22 = vor.u32 %v2814_v20, %v2570_v19  ;;  %v2846_v23 = vld [vmem:[#allocation8 + $0x1ec] sm:$0xf0]  ;;  %v3510_v28 = vperm.slane %v3507_v18, 0  ;;  %v2808_v34 = vld [vmem:[#allocation8 + $0xc4] sm:$0xf] }
  0x7e   : > { %912 = vmatmul.bf16.gmra.mxu2 %v3399_v51  ;;  %v2699_v29 = vor.u32 %v2846_v23, %v2698_v21  ;;  %v2556_v35 = vld [vmem:[#allocation8 + $0xd0] sm:$0xf0]  ;;  %v2840_v36 = vld [vmem:[#allocation8 + $0x1c4] sm:$0xf]  ;;  %v2810_v62 = vld [vmem:[#allocation8 + $0xcc] sm:$0xf0] }
  0x7f   : > { %961 = vmatmul.bf16.gmra.mxu3 %v3401_v52  ;;  %1696 = vmatpush.bf16.msra.mxu2 %v2575_v7  ;;  %v2559_v37 = vor.u32 %v2808_v34, %v2556_v35  ;;  %v2684_v38 = vld [vmem:[#allocation8 + $0x1d0] sm:$0xf0]  ;;  %v2842_v4 = vld [vmem:[#allocation8 + $0x1cc] sm:$0xf0] }
  0x80   : > { %1745 = vmatpush.bf16.msra.mxu3 %v2703_v17  ;;  %1598 = vmatpush.bf16.msra.mxu0 %v2571_v22  ;;  %v2687_v55 = vor.u32 %v2840_v36, %v2684_v38 }
  0x81   : > { %1647 = vmatpush.bf16.msra.mxu1 %v2699_v29  ;;  %v2804_v29 = vld [vmem:[#allocation8 + $0xa4] sm:$0xf] }
  0x83   : > { %1697 = vmatpush.bf16.msra.mxu2 %v2559_v37 }
  0x84   : > { %1746 = vmatpush.bf16.msra.mxu3 %v2687_v55 }
  0x8c   : > { %819 = vmatmul.bf16.gmra.mxu0 %v3415_v12 }
  0x8d   : > { %868 = vmatmul.bf16.gmra.mxu1 %v3417_v13 }
  0x8e   : > { %917 = vmatmul.bf16.gmra.mxu2 %v3419_v14 }
  0x8f   : > { %966 = vmatmul.bf16.gmra.mxu3 %v3421_v15 }
  0x9c   : > { %824 = vmatmul.bf16.gmra.mxu0 %v3435_v40 }
  0x9d   : > { %873 = vmatmul.bf16.gmra.mxu1 %v3437_v41 }
  0x9e   : > { %922 = vmatmul.bf16.gmra.mxu2 %v3439_v42 }
  0x9f   : > { %971 = vmatmul.bf16.gmra.mxu3 %v3441_v43 }
  0xac   : > { %829 = vmatmul.bf16.gmra.mxu0 %v3455_v8 }
  0xad   : > { %878 = vmatmul.bf16.gmra.mxu1 %v3457_v9 }
  0xae   : > { %927 = vmatmul.bf16.gmra.mxu2 %v3459_v10 }
  0xaf   : > { %976 = vmatmul.bf16.gmra.mxu3 %v3461_v11 }
  0xbc   : > { %834 = vmatmul.bf16.gmra.mxu0 %v3475_v44 }
  0xbd   : > { %883 = vmatmul.bf16.gmra.mxu1 %v3477_v45 }
  0xbe   : > { %932 = vmatmul.bf16.gmra.mxu2 %v3479_v46 }
  0xbf   : > { %981 = vmatmul.bf16.gmra.mxu3 %v3481_v47 }
  0xcc   : > { %839 = vmatmul.bf16.gmra.mxu0 %v3495_v0 }
  0xcd   : > { %888 = vmatmul.bf16.gmra.mxu1 %v3497_v1 }
  0xce   : > { %937 = vmatmul.bf16.gmra.mxu2 %v3499_v2 }
  0xcf   : > { %986 = vmatmul.bf16.gmra.mxu3 %v3501_v3 }
  0xd9   : > { %v805_v30 = vpop.f32.mrf.mxu0 }
  0xda   : > { %v806_v31 = vadd.f32 %v805_v30, %v3510_v28  ;;  %v854_v32 = vpop.f32.mrf.mxu1  ;;  %v2540_v30 = vld [vmem:[#allocation8 + $0xb0] sm:$0xf0] }
  0xdc   : > { %v855_v33 = vadd.f32 %v854_v32, %v806_v31  ;;  %1000 = vmatmul.bf16.vlgmr.msrb.gmra.mxu0 %v3355_v48  ;;  %v2836_v31 = vld [vmem:[#allocation8 + $0x1a4] sm:$0xf]  ;;  %v2543_v32 = vor.u32 %v2804_v29, %v2540_v30 }
  0xdd   : > { %1049 = vmatmul.bf16.vlgmr.msrb.gmra.mxu1 %v3357_v53 }
  0xde   : > { %1098 = vmatmul.bf16.vlgmr.msrb.gmra.mxu2 %v3359_v54  ;;  %v2554_v54 = vld [vmem:[#allocation8 + $0xc0] sm:$0xf] }
  0xdf   : > { %1147 = vmatmul.bf16.vlgmr.msrb.gmra.mxu3 %v3361_v57  ;;  %v2682_v57 = vld [vmem:[#allocation8 + $0x1c0] sm:$0xf]  ;;  %v2555_v63 = vor.u32 %v2810_v62, %v2554_v54  ;;  %1698 = vmatpush.bf16.msra.mxu2 %v2543_v32 }
  0xe0   : > { %v2683_v5 = vor.u32 %v2842_v4, %v2682_v57 }
  0xe1   : > { %v903_v39 = vpop.f32.mrf.mxu2  ;;  %v807_v59 = vpop.f32.mrf.mxu0  ;;  %1599 = vmatpush.bf16.msra.mxu0 %v2555_v63 }
  0xe2   : > { %v904_v56 = vadd.f32 %v903_v39, %v855_v33  ;;  %v952_v58 = vpop.f32.mrf.mxu3  ;;  %v808_v60 = vadd.f32 %v807_v59, %v3510_v28  ;;  %v856_v48 = vpop.f32.mrf.mxu1  ;;  %1648 = vmatpush.bf16.msra.mxu1 %v2683_v5  ;;  %v2668_v33 = vld [vmem:[#allocation8 + $0x1b0] sm:$0xf0]  ;;  %v2838_v59 = vld [vmem:[#allocation8 + $0x1ac] sm:$0xf0] }
  0xe3   : > { %v2671_v35 = vor.u32 %v2836_v31, %v2668_v33  ;;  %v2802_v33 = vld [vmem:[#allocation8 + $0x8c] sm:$0xf0] }
  0xe4   : > { %v953_v53 = vadd.f32 %v952_v58, %v904_v56  ;;  %v857_v61 = vadd.f32 %v856_v48, %v808_v60  ;;  %v2806_v56 = vld [vmem:[#allocation8 + $0xac] sm:$0xf0] }
  0xe5   : > { %1747 = vmatpush.bf16.msra.mxu3 %v2671_v35  ;;  %v2834_v35 = vld [vmem:[#allocation8 + $0x18c] sm:$0xf0] }
  0xe9   : > { %v905_v6 = vpop.f32.mrf.mxu2  ;;  %v810_v17 = vpop.f32.mrf.mxu0 }
  0xea   : > { %v906_v7 = vadd.f32 %v905_v6, %v857_v61  ;;  %v954_v16 = vpop.f32.mrf.mxu3  ;;  %v811_v19 = vadd.f32 %v810_v17, %v3510_v28  ;;  %v859_v20 = vpop.f32.mrf.mxu1  ;;  %v2800_v6 = vld [vmem:[#allocation8 + $0x84] sm:$0xf] }
  0xec   : > { %v955_v21 = vadd.f32 %v954_v16, %v906_v7  ;;  %v860_v22 = vadd.f32 %v859_v20, %v811_v19  ;;  %1005 = vmatmul.bf16.gmra.mxu0 %v3375_v24  ;;  %v2524_v7 = vld [vmem:[#allocation8 + $0x90] sm:$0xf0]  ;;  %v2832_v16 = vld [vmem:[#allocation8 + $0x184] sm:$0xf] }
  0xed   : > { %1054 = vmatmul.bf16.gmra.mxu1 %v3377_v25  ;;  %v2527_v17 = vor.u32 %v2800_v6, %v2524_v7  ;;  %v2652_v19 = vld [vmem:[#allocation8 + $0x190] sm:$0xf0]  ;;  %v2798_v7 = vld [vmem:[#allocation8 + $0x6c] sm:$0xf0] }
  0xee   : > { %v3520_v23 = vpack.c.bf16 %v955_v21, %v953_v53  ;;  %1103 = vmatmul.bf16.gmra.mxu2 %v3379_v26  ;;  %v2538_v26 = vld [vmem:[#allocation8 + $0xa0] sm:$0xf]  ;;  %v2655_v21 = vor.u32 %v2832_v16, %v2652_v19 }
  0xef   : > { %1152 = vmatmul.bf16.gmra.mxu3 %v3381_v27  ;;  %v2666_v27 = vld [vmem:[#allocation8 + $0x1a0] sm:$0xf]  ;;  %v2539_v58 = vor.u32 %v2806_v56, %v2538_v26  ;;  %1699 = vmatpush.bf16.msra.mxu2 %v2527_v17  ;;  %v2830_v17 = vld [vmem:[#allocation8 + $0x16c] sm:$0xf0] }
  0xf0   : > { %v2667_v60 = vor.u32 %v2838_v59, %v2666_v27  ;;  %1748 = vmatpush.bf16.msra.mxu3 %v2655_v21  ;;  %v2508_v59 = vld [vmem:[#allocation8 + $0x70] sm:$0xf0] }
  0xf1   : > { %v908_v34 = vpop.f32.mrf.mxu2  ;;  %v812_v38 = vpop.f32.mrf.mxu0  ;;  %1600 = vmatpush.bf16.msra.mxu0 %v2539_v58  ;;  %v2796_v58 = vld [vmem:[#allocation8 + $0x64] sm:$0xf] }
  0xf2   : > { %v909_v36 = vadd.f32 %v908_v34, %v860_v22  ;;  %v957_v37 = vpop.f32.mrf.mxu3  ;;  %v813_v24 = vadd.f32 %v812_v38, %v3510_v28  ;;  %v861_v39 = vpop.f32.mrf.mxu1  ;;  %1649 = vmatpush.bf16.msra.mxu1 %v2667_v60  ;;  %v2828_v60 = vld [vmem:[#allocation8 + $0x164] sm:$0xf] }
  0xf4   : > { %v958_v25 = vadd.f32 %v957_v37, %v909_v36  ;;  %v862_v55 = vadd.f32 %v861_v39, %v813_v24 }
  0xf9   : > { %v910_v48 = vpop.f32.mrf.mxu2  ;;  %v815_v54 = vpop.f32.mrf.mxu0 }
  0xfa   : > { %v911_v53 = vadd.f32 %v910_v48, %v862_v55  ;;  %v959_v61 = vpop.f32.mrf.mxu3  ;;  %v816_v62 = vadd.f32 %v815_v54, %v3510_v28  ;;  %v864_v57 = vpop.f32.mrf.mxu1  ;;  %v2511_v48 = vor.u32 %v2796_v58, %v2508_v59 }
  0xfc   : > { %v960_v63 = vadd.f32 %v959_v61, %v911_v53  ;;  %v865_v4 = vadd.f32 %v864_v57, %v816_v62  ;;  %1010 = vmatmul.bf16.gmra.mxu0 %v3395_v49  ;;  %v2636_v53 = vld [vmem:[#allocation8 + $0x170] sm:$0xf0]  ;;  %1700 = vmatpush.bf16.msra.mxu2 %v2511_v48 }
  0xfd   : > { %1059 = vmatmul.bf16.gmra.mxu1 %v3397_v50  ;;  %v2639_v54 = vor.u32 %v2828_v60, %v2636_v53 }
  0xfe   : > { %v3528_v5 = vpack.c.bf16 %v960_v63, %v958_v25  ;;  %1108 = vmatmul.bf16.gmra.mxu2 %v3399_v51  ;;  %v2522_v51 = vld [vmem:[#allocation8 + $0x80] sm:$0xf] }
  0xff   : > { %1157 = vmatmul.bf16.gmra.mxu3 %v3401_v52  ;;  %v2650_v52 = vld [vmem:[#allocation8 + $0x180] sm:$0xf]  ;;  %v2523_v34 = vor.u32 %v2802_v33, %v2522_v51  ;;  %v2792_v51 = vld [vmem:[#allocation8 + $0x44] sm:$0xf]  ;;  %v2492_v33 = vld [vmem:[#allocation8 + $0x50] sm:$0xf0] }
 0x100   : > { %v2651_v36 = vor.u32 %v2834_v35, %v2650_v52  ;;  %1749 = vmatpush.bf16.msra.mxu3 %v2639_v54  ;;  %v2824_v52 = vld [vmem:[#allocation8 + $0x144] sm:$0xf]  ;;  %v2620_v35 = vld [vmem:[#allocation8 + $0x150] sm:$0xf0] }
 0x101   : > { %v913_v20 = vpop.f32.mrf.mxu2  ;;  %v817_v30 = vpop.f32.mrf.mxu0  ;;  %1601 = vmatpush.bf16.msra.mxu0 %v2523_v34  ;;  %v2495_v34 = vor.u32 %v2792_v51, %v2492_v33  ;;  %v2458_v51 = vld [vmem:[#allocation8] sm:$0xf]  ;;  %v2786_v33 = vld [vmem:[#allocation8 + $0xc] sm:$0xf0] }
 0x102   : > { %v914_v22 = vadd.f32 %v913_v20, %v865_v4  ;;  %v962_v29 = vpop.f32.mrf.mxu3  ;;  %v818_v49 = vadd.f32 %v817_v30, %v3510_v28  ;;  %v866_v31 = vpop.f32.mrf.mxu1  ;;  %1650 = vmatpush.bf16.msra.mxu1 %v2651_v36 }
 0x103   : > { %1701 = vmatpush.bf16.msra.mxu2 %v2495_v34 }
 0x104   : > { %v963_v50 = vadd.f32 %v962_v29, %v914_v22  ;;  %v867_v32 = vadd.f32 %v866_v31, %v818_v49 }
 0x109   : > { %v915_v37 = vpop.f32.mrf.mxu2  ;;  %v820_v39 = vpop.f32.mrf.mxu0 }
 0x10a   : > { %v916_v38 = vadd.f32 %v915_v37, %v867_v32  ;;  %v964_v24 = vpop.f32.mrf.mxu3  ;;  %v821_v25 = vadd.f32 %v820_v39, %v3510_v28  ;;  %v869_v55 = vpop.f32.mrf.mxu1  ;;  %v2623_v37 = vor.u32 %v2824_v52, %v2620_v35  ;;  %v2784_v52 = vld [vmem:[#allocation8 + $0x4] sm:$0xf] }
 0x10c   : > { %v965_v26 = vadd.f32 %v964_v24, %v916_v38  ;;  %v870_v56 = vadd.f32 %v869_v55, %v821_v25  ;;  %1015 = vmatmul.bf16.gmra.mxu0 %v3415_v12  ;;  %1750 = vmatpush.bf16.msra.mxu3 %v2623_v37  ;;  %v2490_v55 = vld [vmem:[#allocation8 + $0x40] sm:$0xf]  ;;  %v2459_v37 = vor.u32 %v2786_v33, %v2458_v51 }
 0x10d   : > { %1064 = vmatmul.bf16.gmra.mxu1 %v3417_v13 }
 0x10e   : > { %v3536_v27 = vpack.c.bf16 %v965_v26, %v963_v50  ;;  %1113 = vmatmul.bf16.gmra.mxu2 %v3419_v14  ;;  %v2506_v14 = vld [vmem:[#allocation8 + $0x60] sm:$0xf] }
 0x10f   : > { %1162 = vmatmul.bf16.gmra.mxu3 %v3421_v15  ;;  %v2634_v15 = vld [vmem:[#allocation8 + $0x160] sm:$0xf]  ;;  %v2507_v16 = vor.u32 %v2798_v7, %v2506_v14  ;;  %v2604_v7 = vld [vmem:[#allocation8 + $0x130] sm:$0xf0] }
 0x110   : > { %v2635_v19 = vor.u32 %v2830_v17, %v2634_v15  ;;  %v2618_v26 = vld [vmem:[#allocation8 + $0x140] sm:$0xf] }
 0x111   : > { %v918_v61 = vpop.f32.mrf.mxu2  ;;  %v822_v63 = vpop.f32.mrf.mxu0  ;;  %1602 = vmatpush.bf16.msra.mxu0 %v2507_v16 }
 0x112   : > { %v919_v62 = vadd.f32 %v918_v61, %v870_v56  ;;  %v967_v57 = vpop.f32.mrf.mxu3  ;;  %v823_v12 = vadd.f32 %v822_v63, %v3510_v28  ;;  %v871_v4 = vpop.f32.mrf.mxu1  ;;  %1651 = vmatpush.bf16.msra.mxu1 %v2635_v19  ;;  %v2826_v56 = vld [vmem:[#allocation8 + $0x14c] sm:$0xf0] }
 0x113   : > { %v2619_v58 = vor.u32 %v2826_v56, %v2618_v26  ;;  %v2588_v26 = vld [vmem:[#allocation8 + $0x110] sm:$0xf0] }
 0x114   : > { %v968_v13 = vadd.f32 %v967_v57, %v919_v62  ;;  %v872_v6 = vadd.f32 %v871_v4, %v823_v12  ;;  %v2788_v4 = vld [vmem:[#allocation8 + $0x24] sm:$0xf] }
 0x116   : > { %1652 = vmatpush.bf16.msra.mxu1 %v2619_v58 }
 0x119   : > { %v920_v20 = vpop.f32.mrf.mxu2  ;;  %v825_v29 = vpop.f32.mrf.mxu0 }
 0x11a   : > { %v921_v21 = vadd.f32 %v920_v20, %v872_v6  ;;  %v969_v22 = vpop.f32.mrf.mxu3  ;;  %v826_v30 = vadd.f32 %v825_v29, %v3510_v28  ;;  %v874_v49 = vpop.f32.mrf.mxu1  ;;  %v2820_v6 = vld [vmem:[#allocation8 + $0x124] sm:$0xf]  ;;  %v2602_v29 = vld [vmem:[#allocation8 + $0x120] sm:$0xf] }
 0x11b   : > { %v2607_v16 = vor.u32 %v2820_v6, %v2604_v7 }
 0x11c   : > { %v970_v31 = vadd.f32 %v969_v22, %v921_v21  ;;  %v875_v50 = vadd.f32 %v874_v49, %v826_v30  ;;  %1020 = vmatmul.bf16.gmra.mxu0 %v3435_v40  ;;  %v2474_v22 = vld [vmem:[#allocation8 + $0x20] sm:$0xf]  ;;  %v2822_v30 = vld [vmem:[#allocation8 + $0x12c] sm:$0xf0] }
 0x11d   : > { %1069 = vmatmul.bf16.gmra.mxu1 %v3437_v41  ;;  %1751 = vmatpush.bf16.msra.mxu3 %v2607_v16  ;;  %v2603_v49 = vor.u32 %v2822_v30, %v2602_v29  ;;  %v2580_v16 = vld [vmem:[#allocation8 + $0xf8] sm:$0xf0]  ;;  %v2706_v30 = vld [vmem:[#allocation8 + $0x1e8] sm:$0xf] }
 0x11e   : > { %v3544_v32 = vpack.c.bf16 %v970_v31, %v968_v13  ;;  %1118 = vmatmul.bf16.gmra.mxu2 %v3439_v42  ;;  %v2794_v42 = vld [vmem:[#allocation8 + $0x4c] sm:$0xf0]  ;;  %v2476_v13 = vld [vmem:[#allocation8 + $0x30] sm:$0xf0] }
 0x11f   : > { %1167 = vmatmul.bf16.gmra.mxu3 %v3441_v43  ;;  %v2491_v43 = vor.u32 %v2794_v42, %v2490_v55  ;;  %v2479_v14 = vor.u32 %v2788_v4, %v2476_v13  ;;  %1653 = vmatpush.bf16.msra.mxu1 %v2603_v49  ;;  %v2816_v42 = vld [vmem:[#allocation8 + $0x104] sm:$0xf] }
 0x121   : > { %v923_v36 = vpop.f32.mrf.mxu2  ;;  %v827_v39 = vpop.f32.mrf.mxu0  ;;  %1603 = vmatpush.bf16.msra.mxu0 %v2491_v43  ;;  %1702 = vmatpush.bf16.msra.mxu2 %v2479_v14  ;;  %v2591_v43 = vor.u32 %v2816_v42, %v2588_v26 }
 0x122   : > { %v924_v38 = vadd.f32 %v923_v36, %v875_v50  ;;  %v972_v24 = vpop.f32.mrf.mxu3  ;;  %v876_v40 = vpop.f32.mrf.mxu1  ;;  %v828_v41 = vadd.f32 %v827_v39, %v3510_v28 }
 0x123   : > { %1752 = vmatpush.bf16.msra.mxu3 %v2591_v43 }
 0x124   : > { %v973_v25 = vadd.f32 %v972_v24, %v924_v38  ;;  %v877_v59 = vadd.f32 %v876_v40, %v828_v41  ;;  %v2460_v38 = vld [vmem:[#allocation8 + $0x10] sm:$0xf0] }
 0x125   : > { %v2463_v40 = vor.u32 %v2784_v52, %v2460_v38  ;;  %v2809_v38 = vld [vmem:[#allocation8 + $0xcc] sm:$0xf] }
 0x127   : > { %1703 = vmatpush.bf16.msra.mxu2 %v2463_v40 }
 0x129   : > { %v925_v60 = vpop.f32.mrf.mxu2  ;;  %v830_v61 = vpop.f32.mrf.mxu0 }
 0x12a   : > { %v926_v48 = vadd.f32 %v925_v60, %v877_v59  ;;  %v974_v53 = vpop.f32.mrf.mxu3  ;;  %v831_v54 = vadd.f32 %v830_v61, %v3510_v28  ;;  %v879_v62 = vpop.f32.mrf.mxu1  ;;  %v2586_v61 = vld [vmem:[#allocation8 + $0x100] sm:$0xf] }
 0x12c   : > { %v975_v57 = vadd.f32 %v974_v53, %v926_v48  ;;  %v880_v63 = vadd.f32 %v879_v62, %v831_v54  ;;  %1025 = vmatmul.bf16.gmra.mxu0 %v3455_v8  ;;  %v2818_v54 = vld [vmem:[#allocation8 + $0x10c] sm:$0xf0] }
 0x12d   : > { %1074 = vmatmul.bf16.gmra.mxu1 %v3457_v9  ;;  %v2587_v62 = vor.u32 %v2818_v54, %v2586_v61  ;;  %v2843_v61 = vld [vmem:[#allocation8 + $0x1d4] sm:$0xf0] }
 0x12e   : > { %v3552_v12 = vpack.c.bf16 %v975_v57, %v973_v25  ;;  %1123 = vmatmul.bf16.gmra.mxu2 %v3459_v10  ;;  %v2790_v10 = vld [vmem:[#allocation8 + $0x2c] sm:$0xf0] }
 0x12f   : > { %1172 = vmatmul.bf16.gmra.mxu3 %v3461_v11  ;;  %v2475_v11 = vor.u32 %v2790_v10, %v2474_v22  ;;  %1654 = vmatpush.bf16.msra.mxu1 %v2587_v62 }
 0x131   : > { %v928_v15 = vpop.f32.mrf.mxu2  ;;  %v832_v20 = vpop.f32.mrf.mxu0  ;;  %1604 = vmatpush.bf16.msra.mxu0 %v2475_v11  ;;  %v2578_v11 = vld [vmem:[#allocation8 + $0xe8] sm:$0xf] }
 0x132   : > { %v929_v17 = vadd.f32 %v928_v15, %v880_v63  ;;  %v977_v19 = vpop.f32.mrf.mxu3  ;;  %v881_v8 = vpop.f32.mrf.mxu1  ;;  %v833_v9 = vadd.f32 %v832_v20, %v3510_v28  ;;  %v2813_v15 = vld [vmem:[#allocation8 + $0xec] sm:$0xf]  ;;  %v2708_v20 = vld [vmem:[#allocation8 + $0x1f8] sm:$0xf0] }
 0x134   : > { %v978_v21 = vadd.f32 %v977_v19, %v929_v17  ;;  %v882_v31 = vadd.f32 %v881_v8, %v833_v9  ;;  %v2583_v17 = vor.u32 %v2813_v15, %v2580_v16  ;;  %v2845_v19 = vld [vmem:[#allocation8 + $0x1ec] sm:$0xf]  ;;  %v2548_v16 = vld [vmem:[#allocation8 + $0xb8] sm:$0xf0] }
 0x135   : > { %1605 = vmatpush.bf16.msra.mxu0 %v2459_v37  ;;  %v3575_v37 = vperm.slane %v3507_v18, 1  ;;  %v2805_v15 = vld [vmem:[#allocation8 + $0xac] sm:$0xf] }
 0x136   : > { %1892 = vmatpush.bf16.msrb.mxu2 %v2583_v17  ;;  %v2551_v17 = vor.u32 %v2805_v15, %v2548_v16 }
 0x139   : > { %v930_v50 = vpop.f32.mrf.mxu2  ;;  %v835_v36 = vpop.f32.mrf.mxu0 }
 0x13a   : > { %v931_v34 = vadd.f32 %v930_v50, %v882_v31  ;;  %v979_v35 = vpop.f32.mrf.mxu3  ;;  %v836_v24 = vadd.f32 %v835_v36, %v3510_v28  ;;  %v884_v39 = vpop.f32.mrf.mxu1  ;;  %v2847_v31 = vld [vmem:[#allocation8 + $0x1f4] sm:$0xf0] }
 0x13c   : > { %v980_v25 = vadd.f32 %v979_v35, %v931_v34  ;;  %v885_v41 = vadd.f32 %v884_v39, %v836_v24  ;;  %1030 = vmatmul.bf16.gmra.mxu0 %v3475_v44  ;;  %v2564_v24 = vld [vmem:[#allocation8 + $0xd8] sm:$0xf0] }
 0x13d   : > { %1079 = vmatmul.bf16.gmra.mxu1 %v3477_v45  ;;  %v2567_v39 = vor.u32 %v2809_v38, %v2564_v24 }
 0x13e   : > { %v3560_v55 = vpack.c.bf16 %v980_v25, %v978_v21  ;;  %1128 = vmatmul.bf16.gmra.mxu2 %v3479_v46  ;;  %v2711_v21 = vor.u32 %v2845_v19, %v2708_v20  ;;  %v2841_v25 = vld [vmem:[#allocation8 + $0x1cc] sm:$0xf] }
 0x13f   : > { %1177 = vmatmul.bf16.gmra.mxu3 %v3481_v47  ;;  %1893 = vmatpush.bf16.msrb.mxu2 %v2567_v39  ;;  %v2837_v20 = vld [vmem:[#allocation8 + $0x1ac] sm:$0xf] }
 0x140   : > { %1941 = vmatpush.bf16.msrb.mxu3 %v2711_v21 }
 0x141   : > { %v933_v56 = vpop.f32.mrf.mxu2  ;;  %v837_v60 = vpop.f32.mrf.mxu0 }
 0x142   : > { %v934_v58 = vadd.f32 %v933_v56, %v885_v41  ;;  %v982_v59 = vpop.f32.mrf.mxu3  ;;  %v886_v48 = vpop.f32.mrf.mxu1  ;;  %v838_v44 = vadd.f32 %v837_v60, %v3510_v28  ;;  %v2692_v41 = vld [vmem:[#allocation8 + $0x1d8] sm:$0xf0]  ;;  %v2562_v60 = vld [vmem:[#allocation8 + $0xc8] sm:$0xf] }
 0x143   : > { %v2695_v26 = vor.u32 %v2841_v25, %v2692_v41  ;;  %1894 = vmatpush.bf16.msrb.mxu2 %v2551_v17  ;;  %v2532_v25 = vld [vmem:[#allocation8 + $0x98] sm:$0xf0] }
 0x144   : > { %v983_v53 = vadd.f32 %v982_v59, %v934_v58  ;;  %v887_v45 = vadd.f32 %v886_v48, %v838_v44  ;;  %v2811_v48 = vld [vmem:[#allocation8 + $0xd4] sm:$0xf0] }
 0x145   : > { %1942 = vmatpush.bf16.msrb.mxu3 %v2695_v26  ;;  %v2563_v44 = vor.u32 %v2811_v48, %v2562_v60  ;;  %v2833_v26 = vld [vmem:[#allocation8 + $0x18c] sm:$0xf] }
 0x149   : > { %v935_v46 = vpop.f32.mrf.mxu2  ;;  %v840_v4 = vpop.f32.mrf.mxu0 }
 0x14a   : > { %v936_v57 = vadd.f32 %v935_v46, %v887_v45  ;;  %v984_v63 = vpop.f32.mrf.mxu3  ;;  %v841_v47 = vadd.f32 %v840_v4, %v3510_v28  ;;  %v889_v13 = vpop.f32.mrf.mxu1 }
 0x14c   : > { %v985_v6 = vadd.f32 %v984_v63, %v936_v57  ;;  %v890_v14 = vadd.f32 %v889_v13, %v841_v47  ;;  %1035 = vmatmul.bf16.gmra.mxu0 %v3495_v0 }
 0x14d   : > { %1084 = vmatmul.bf16.gmra.mxu1 %v3497_v1 }
 0x14e   : > { %v3568_v7 = vpack.c.bf16 %v985_v6, %v983_v53  ;;  %1133 = vmatmul.bf16.gmra.mxu2 %v3499_v2  ;;  %v2815_v2 = vld [vmem:[#allocation8 + $0xf4] sm:$0xf0]  ;;  %v2690_v53 = vld [vmem:[#allocation8 + $0x1c8] sm:$0xf] }
 0x14f   : > { %1182 = vmatmul.bf16.gmra.mxu3 %v3501_v3  ;;  %v2579_v49 = vor.u32 %v2815_v2, %v2578_v11  ;;  %v2707_v3 = vor.u32 %v2847_v31, %v2706_v30  ;;  %v2691_v54 = vor.u32 %v2843_v61, %v2690_v53  ;;  %v2546_v11 = vld [vmem:[#allocation8 + $0xa8] sm:$0xf]  ;;  %v2807_v2 = vld [vmem:[#allocation8 + $0xb4] sm:$0xf0] }
 0x150   : > { %v2674_v30 = vld [vmem:[#allocation8 + $0x1a8] sm:$0xf]  ;;  %v2839_v31 = vld [vmem:[#allocation8 + $0x1b4] sm:$0xf0] }
 0x151   : > { %v938_v8 = vpop.f32.mrf.mxu2  ;;  %v842_v10 = vpop.f32.mrf.mxu0  ;;  %1794 = vmatpush.bf16.msrb.mxu0 %v2579_v49  ;;  %1843 = vmatpush.bf16.msrb.mxu1 %v2707_v3  ;;  %v2547_v49 = vor.u32 %v2807_v2, %v2546_v11  ;;  %v2675_v3 = vor.u32 %v2839_v31, %v2674_v30  ;;  %v2803_v61 = vld [vmem:[#allocation8 + $0x94] sm:$0xf0]  ;;  %v2514_v31 = vld [vmem:[#allocation8 + $0x68] sm:$0xf] }
 0x152   : > { %v939_v9 = vadd.f32 %v938_v8, %v890_v14  ;;  %v987_v22 = vpop.f32.mrf.mxu3  ;;  %v891_v0 = vpop.f32.mrf.mxu1  ;;  %v843_v1 = vadd.f32 %v842_v10, %v3510_v28  ;;  %v2676_v8 = vld [vmem:[#allocation8 + $0x1b8] sm:$0xf0] }
 0x154   : > { %v988_v29 = vadd.f32 %v987_v22, %v939_v9  ;;  %v892_v50 = vadd.f32 %v891_v0, %v843_v1  ;;  %v2679_v9 = vor.u32 %v2837_v20, %v2676_v8  ;;  %v2797_v20 = vld [vmem:[#allocation8 + $0x6c] sm:$0xf]  ;;  %v2516_v8 = vld [vmem:[#allocation8 + $0x78] sm:$0xf0] }
 0x155   : > { %1795 = vmatpush.bf16.msrb.mxu0 %v2563_v44  ;;  %1844 = vmatpush.bf16.msrb.mxu1 %v2691_v54  ;;  %v2530_v44 = vld [vmem:[#allocation8 + $0x88] sm:$0xf] }
 0x156   : > { %1943 = vmatpush.bf16.msrb.mxu3 %v2679_v9  ;;  %v2658_v54 = vld [vmem:[#allocation8 + $0x188] sm:$0xf] }
 0x159   : > { %v940_v51 = vpop.f32.mrf.mxu2  ;;  %v1001_v34 = vpop.f32.mrf.mxu0  ;;  %1796 = vmatpush.bf16.msrb.mxu0 %v2547_v49  ;;  %1845 = vmatpush.bf16.msrb.mxu1 %v2675_v3  ;;  %v2799_v3 = vld [vmem:[#allocation8 + $0x74] sm:$0xf0] }
 0x15a   : > { %v941_v33 = vadd.f32 %v940_v51, %v892_v50  ;;  %v989_v52 = vpop.f32.mrf.mxu3  ;;  %v1050_v35 = vpop.f32.mrf.mxu1  ;;  %v1002_v40 = vadd.f32 %v1001_v34, %v3575_v37 }
 0x15c   : > { %v990_v36 = vadd.f32 %v989_v52, %v941_v33  ;;  %1606 = vmatmul.bf16.vlgmr.msra.gmra.mxu0 %v3520_v23  ;;  %v1051_v58 = vadd.f32 %v1050_v35, %v1002_v40  ;;  %v2801_v40 = vld [vmem:[#allocation8 + $0x8c] sm:$0xf] }
 0x15d   : > { %v2535_v41 = vor.u32 %v2801_v40, %v2532_v25 }
 0x15e   : > { %v3578_v28 = vpack.c.bf16 %v990_v36, %v988_v29  ;;  %1704 = vmatmul.bf16.vlgmr.msra.gmra.mxu2 %v3520_v23 }
 0x15f   : > { %1895 = vmatpush.bf16.msrb.mxu2 %v2535_v41 }
 0x161   : > { %v1099_v42 = vpop.f32.mrf.mxu2  ;;  %v1003_v56 = vpop.f32.mrf.mxu0 }
 0x162   : > { %v1148_v43 = vpop.f32.mrf.mxu3  ;;  %v1052_v18 = vpop.f32.mrf.mxu1  ;;  %v1004_v59 = vadd.f32 %v1003_v56, %v3575_v37  ;;  %v1100_v62 = vadd.f32 %v1099_v42, %v1051_v58 }
 0x164   : > { %v1053_v45 = vadd.f32 %v1052_v18, %v1004_v59  ;;  %v1149_v13 = vadd.f32 %v1148_v43, %v1100_v62  ;;  %v2660_v43 = vld [vmem:[#allocation8 + $0x198] sm:$0xf0]  ;;  %v2531_v62 = vor.u32 %v2803_v61, %v2530_v44 }
 0x165   : > { %v2663_v18 = vor.u32 %v2833_v26, %v2660_v43  ;;  %v2793_v43 = vld [vmem:[#allocation8 + $0x4c] sm:$0xf] }
 0x166   : > { %1797 = vmatpush.bf16.msrb.mxu0 %v2531_v62 }
 0x167   : > { %1944 = vmatpush.bf16.msrb.mxu3 %v2663_v18 }
 0x169   : > { %v1101_v46 = vpop.f32.mrf.mxu2  ;;  %v1006_v4 = vpop.f32.mrf.mxu0 }
 0x16a   : > { %v1102_v57 = vadd.f32 %v1101_v46, %v1053_v45  ;;  %v1150_v63 = vpop.f32.mrf.mxu3  ;;  %v1055_v47 = vpop.f32.mrf.mxu1  ;;  %v1007_v19 = vadd.f32 %v1006_v4, %v3575_v37  ;;  %v2835_v45 = vld [vmem:[#allocation8 + $0x194] sm:$0xf0] }
 0x16b   : > { %v2659_v46 = vor.u32 %v2835_v45, %v2658_v54 }
 0x16c   : > { %v1151_v6 = vadd.f32 %v1150_v63, %v1102_v57  ;;  %1611 = vmatmul.bf16.gmra.mxu0 %v3528_v5  ;;  %v1056_v29 = vadd.f32 %v1055_v47, %v1007_v19 }
 0x16d   : > { %1846 = vmatpush.bf16.msrb.mxu1 %v2659_v46  ;;  %v2498_v46 = vld [vmem:[#allocation8 + $0x48] sm:$0xf] }
 0x16e   : > { %v3584_v14 = vpack.c.bf16 %v1151_v6, %v1149_v13  ;;  %1709 = vmatmul.bf16.gmra.mxu2 %v3528_v5 }
 0x170   : > { %1655 = vmatmul.bf16.vlgmr.msra.gmra.mxu1 %v3584_v14  ;;  %1753 = vmatmul.bf16.vlgmr.msra.gmra.mxu3 %v3584_v14 }
 0x171   : > { %v1104_v21 = vpop.f32.mrf.mxu2  ;;  %v1008_v10 = vpop.f32.mrf.mxu0 }
 0x172   : > { %v1153_v22 = vpop.f32.mrf.mxu3  ;;  %v1057_v0 = vpop.f32.mrf.mxu1  ;;  %v1009_v1 = vadd.f32 %v1008_v10, %v3575_v37  ;;  %v1105_v50 = vadd.f32 %v1104_v21, %v1056_v29  ;;  %v2519_v21 = vor.u32 %v2797_v20, %v2516_v8  ;;  %v2644_v10 = vld [vmem:[#allocation8 + $0x178] sm:$0xf0] }
 0x174   : > { %v1058_v51 = vadd.f32 %v1057_v0, %v1009_v1  ;;  %v1154_v38 = vadd.f32 %v1153_v22, %v1105_v50  ;;  %v2829_v22 = vld [vmem:[#allocation8 + $0x16c] sm:$0xf]  ;;  %1896 = vmatpush.bf16.msrb.mxu2 %v2519_v21  ;;  %v2642_v50 = vld [vmem:[#allocation8 + $0x168] sm:$0xf] }
 0x175   : > { %v2647_v29 = vor.u32 %v2829_v22, %v2644_v10 }
 0x177   : > { %1945 = vmatpush.bf16.msrb.mxu3 %v2647_v29  ;;  %v2484_v29 = vld [vmem:[#allocation8 + $0x38] sm:$0xf0] }
 0x179   : > { %v1106_v33 = vpop.f32.mrf.mxu2  ;;  %v1011_v35 = vpop.f32.mrf.mxu0 }
 0x17a   : > { %v1107_v52 = vadd.f32 %v1106_v33, %v1058_v51  ;;  %v1155_v34 = vpop.f32.mrf.mxu3  ;;  %v1060_v36 = vpop.f32.mrf.mxu1  ;;  %v1012_v42 = vadd.f32 %v1011_v35, %v3575_v37  ;;  %v2515_v51 = vor.u32 %v2799_v3, %v2514_v31  ;;  %v2831_v33 = vld [vmem:[#allocation8 + $0x174] sm:$0xf0] }
 0x17c   : > { %v1156_v24 = vadd.f32 %v1155_v34, %v1107_v52  ;;  %1616 = vmatmul.bf16.gmra.mxu0 %v3536_v27  ;;  %v1061_v48 = vadd.f32 %v1060_v36, %v1012_v42  ;;  %v2643_v52 = vor.u32 %v2831_v33, %v2642_v50 }
 0x17d   : > { %1798 = vmatpush.bf16.msrb.mxu0 %v2515_v51 }
 0x17e   : > { %v3592_v39 = vpack.c.bf16 %v1156_v24, %v1154_v38  ;;  %1714 = vmatmul.bf16.gmra.mxu2 %v3536_v27  ;;  %1847 = vmatpush.bf16.msrb.mxu1 %v2643_v52 }
 0x180   : > { %1660 = vmatmul.bf16.gmra.mxu1 %v3592_v39  ;;  %1758 = vmatmul.bf16.gmra.mxu3 %v3592_v39 }
 0x181   : > { %v1109_v56 = vpop.f32.mrf.mxu2  ;;  %v1013_v59 = vpop.f32.mrf.mxu0 }
 0x182   : > { %v1158_v58 = vpop.f32.mrf.mxu3  ;;  %v1062_v60 = vpop.f32.mrf.mxu1  ;;  %v1014_v53 = vadd.f32 %v1013_v59, %v3575_v37  ;;  %v1110_v57 = vadd.f32 %v1109_v56, %v1061_v48  ;;  %v2500_v56 = vld [vmem:[#allocation8 + $0x58] sm:$0xf0]  ;;  %v2825_v59 = vld [vmem:[#allocation8 + $0x14c] sm:$0xf] }
 0x183   : > { %v2503_v18 = vor.u32 %v2793_v43, %v2500_v56  ;;  %v2466_v43 = vld [vmem:[#allocation8 + $0x8] sm:$0xf]  ;;  %v2787_v56 = vld [vmem:[#allocation8 + $0x14] sm:$0xf0] }
 0x184   : > { %v1063_v63 = vadd.f32 %v1062_v60, %v1014_v53  ;;  %v1159_v16 = vadd.f32 %v1158_v58, %v1110_v57  ;;  %v2628_v60 = vld [vmem:[#allocation8 + $0x158] sm:$0xf0]  ;;  %v2795_v57 = vld [vmem:[#allocation8 + $0x54] sm:$0xf0] }
 0x185   : > { %1897 = vmatpush.bf16.msrb.mxu2 %v2503_v18  ;;  %v2631_v53 = vor.u32 %v2825_v59, %v2628_v60  ;;  %v2785_v18 = vld [vmem:[#allocation8 + $0xc] sm:$0xf] }
 0x187   : > { %1946 = vmatpush.bf16.msrb.mxu3 %v2631_v53  ;;  %v2468_v53 = vld [vmem:[#allocation8 + $0x18] sm:$0xf0] }
 0x189   : > { %v1111_v4 = vpop.f32.mrf.mxu2  ;;  %v1016_v6 = vpop.f32.mrf.mxu0 }
 0x18a   : > { %v1112_v47 = vadd.f32 %v1111_v4, %v1063_v63  ;;  %v1160_v13 = vpop.f32.mrf.mxu3  ;;  %v1065_v15 = vpop.f32.mrf.mxu1  ;;  %v1017_v9 = vadd.f32 %v1016_v6, %v3575_v37  ;;  %v2626_v63 = vld [vmem:[#allocation8 + $0x148] sm:$0xf]  ;;  %v2499_v4 = vor.u32 %v2795_v57, %v2498_v46  ;;  %v2817_v57 = vld [vmem:[#allocation8 + $0x10c] sm:$0xf] }
 0x18c   : > { %v1161_v17 = vadd.f32 %v1160_v13, %v1112_v47  ;;  %1621 = vmatmul.bf16.gmra.mxu0 %v3544_v32  ;;  %v1066_v30 = vadd.f32 %v1065_v15, %v1017_v9  ;;  %v2827_v47 = vld [vmem:[#allocation8 + $0x154] sm:$0xf0] }
 0x18d   : > { %v2627_v13 = vor.u32 %v2827_v47, %v2626_v63  ;;  %1799 = vmatpush.bf16.msrb.mxu0 %v2499_v4  ;;  %v2596_v63 = vld [vmem:[#allocation8 + $0x118] sm:$0xf0] }
 0x18e   : > { %v3600_v19 = vpack.c.bf16 %v1161_v17, %v1159_v16  ;;  %1719 = vmatmul.bf16.gmra.mxu2 %v3544_v32  ;;  %v2599_v47 = vor.u32 %v2817_v57, %v2596_v63 }
 0x18f   : > { %1848 = vmatpush.bf16.msrb.mxu1 %v2627_v13 }
 0x190   : > { %1665 = vmatmul.bf16.gmra.mxu1 %v3600_v19  ;;  %1763 = vmatmul.bf16.gmra.mxu3 %v3600_v19 }
 0x191   : > { %v1114_v0 = vpop.f32.mrf.mxu2  ;;  %v1018_v11 = vpop.f32.mrf.mxu0 }
 0x192   : > { %v1163_v1 = vpop.f32.mrf.mxu3  ;;  %v1067_v2 = vpop.f32.mrf.mxu1  ;;  %v1019_v49 = vadd.f32 %v1018_v11, %v3575_v37  ;;  %v1115_v34 = vadd.f32 %v1114_v0, %v1066_v30  ;;  %v2789_v0 = vld [vmem:[#allocation8 + $0x2c] sm:$0xf]  ;;  %v2612_v30 = vld [vmem:[#allocation8 + $0x138] sm:$0xf0] }
 0x194   : > { %v1068_v35 = vadd.f32 %v1067_v2, %v1019_v49  ;;  %v1164_v41 = vadd.f32 %v1163_v1, %v1115_v34  ;;  %v2487_v1 = vor.u32 %v2789_v0, %v2484_v29  ;;  %v2821_v2 = vld [vmem:[#allocation8 + $0x12c] sm:$0xf]  ;;  %v2482_v34 = vld [vmem:[#allocation8 + $0x28] sm:$0xf] }
 0x195   : > { %v2615_v31 = vor.u32 %v2821_v2, %v2612_v30 }
 0x196   : > { %1898 = vmatpush.bf16.msrb.mxu2 %v2487_v1 }
 0x197   : > { %1947 = vmatpush.bf16.msrb.mxu3 %v2615_v31 }
 0x199   : > { %v1116_v36 = vpop.f32.mrf.mxu2  ;;  %v1021_v40 = vpop.f32.mrf.mxu0 }
 0x19a   : > { %v1117_v38 = vadd.f32 %v1116_v36, %v1068_v35  ;;  %v1165_v24 = vpop.f32.mrf.mxu3  ;;  %v1070_v25 = vpop.f32.mrf.mxu1  ;;  %v1022_v58 = vadd.f32 %v1021_v40, %v3575_v37  ;;  %v2791_v35 = vld [vmem:[#allocation8 + $0x34] sm:$0xf0]  ;;  %v2610_v36 = vld [vmem:[#allocation8 + $0x128] sm:$0xf] }
 0x19b   : > { %1948 = vmatpush.bf16.msrb.mxu3 %v2599_v47 }
 0x19c   : > { %v1166_v42 = vadd.f32 %v1165_v24, %v1117_v38  ;;  %1626 = vmatmul.bf16.gmra.mxu0 %v3552_v12  ;;  %v1071_v62 = vadd.f32 %v1070_v25, %v1022_v58  ;;  %v2483_v38 = vor.u32 %v2791_v35, %v2482_v34  ;;  %v2823_v24 = vld [vmem:[#allocation8 + $0x134] sm:$0xf0] }
 0x19d   : > { %v2611_v40 = vor.u32 %v2823_v24, %v2610_v36 }
 0x19e   : > { %v3608_v26 = vpack.c.bf16 %v1166_v42, %v1164_v41  ;;  %1724 = vmatmul.bf16.gmra.mxu2 %v3552_v12  ;;  %1800 = vmatpush.bf16.msrb.mxu0 %v2483_v38 }
 0x19f   : > { %1849 = vmatpush.bf16.msrb.mxu1 %v2611_v40 }
 0x1a0   : > { %1670 = vmatmul.bf16.gmra.mxu1 %v3608_v26  ;;  %1768 = vmatmul.bf16.gmra.mxu3 %v3608_v26 }
 0x1a1   : > { %v1119_v48 = vpop.f32.mrf.mxu2  ;;  %v1023_v61 = vpop.f32.mrf.mxu0 }
 0x1a2   : > { %v1168_v44 = vpop.f32.mrf.mxu3  ;;  %v1072_v54 = vpop.f32.mrf.mxu1  ;;  %v1024_v45 = vadd.f32 %v1023_v61, %v3575_v37  ;;  %v1120_v6 = vadd.f32 %v1119_v48, %v1071_v62  ;;  %v2467_v48 = vor.u32 %v2787_v56, %v2466_v43  ;;  %v2471_v61 = vor.u32 %v2785_v18, %v2468_v53 }
 0x1a4   : > { %v1073_v15 = vadd.f32 %v1072_v54, %v1024_v45  ;;  %v1169_v9 = vadd.f32 %v1168_v44, %v1120_v6  ;;  %1801 = vmatpush.bf16.msrb.mxu0 %v2467_v48  ;;  %1899 = vmatpush.bf16.msrb.mxu2 %v2471_v61 }
 0x1a9   : > { %v1121_v16 = vpop.f32.mrf.mxu2  ;;  %v1026_v8 = vpop.f32.mrf.mxu0 }
 0x1aa   : > { %v1122_v17 = vadd.f32 %v1121_v16, %v1073_v15  ;;  %v1170_v20 = vpop.f32.mrf.mxu3  ;;  %v1075_v21 = vpop.f32.mrf.mxu1  ;;  %v1027_v11 = vadd.f32 %v1026_v8, %v3575_v37  ;;  %v2594_v16 = vld [vmem:[#allocation8 + $0x108] sm:$0xf] }
 0x1ac   : > { %v1171_v22 = vadd.f32 %v1170_v20, %v1122_v17  ;;  %1631 = vmatmul.bf16.gmra.mxu0 %v3560_v55  ;;  %v1076_v33 = vadd.f32 %v1075_v21, %v1027_v11  ;;  %v2819_v17 = vld [vmem:[#allocation8 + $0x114] sm:$0xf0] }
 0x1ad   : > { %v2595_v21 = vor.u32 %v2819_v17, %v2594_v16 }
 0x1ae   : > { %v3616_v10 = vpack.c.bf16 %v1171_v22, %v1169_v9  ;;  %1729 = vmatmul.bf16.gmra.mxu2 %v3560_v55 }
 0x1af   : > { %1850 = vmatpush.bf16.msrb.mxu1 %v2595_v21 }
 0x1b0   : > { %1675 = vmatmul.bf16.gmra.mxu1 %v3616_v10  ;;  %1773 = vmatmul.bf16.gmra.mxu3 %v3616_v10 }
 0x1b1   : > { %v1124_v49 = vpop.f32.mrf.mxu2  ;;  %v1028_v50 = vpop.f32.mrf.mxu0 }
 0x1b2   : > { %v1173_v3 = vpop.f32.mrf.mxu3  ;;  %v1077_v51 = vpop.f32.mrf.mxu1  ;;  %v1029_v52 = vadd.f32 %v1028_v50, %v3575_v37  ;;  %v1125_v25 = vadd.f32 %v1124_v49, %v1076_v33 }
 0x1b4   : > { %v1078_v41 = vadd.f32 %v1077_v51, %v1029_v52  ;;  %v1174_v54 = vadd.f32 %v1173_v3, %v1125_v25 }
 0x1b9   : > { %v1126_v42 = vpop.f32.mrf.mxu2  ;;  %v1031_v60 = vpop.f32.mrf.mxu0 }
 0x1ba   : > { %v1127_v58 = vadd.f32 %v1126_v42, %v1078_v41  ;;  %v1175_v59 = vpop.f32.mrf.mxu3  ;;  %v1080_v44 = vpop.f32.mrf.mxu1  ;;  %v1032_v46 = vadd.f32 %v1031_v60, %v3575_v37 }
 0x1bc   : > { %v1176_v62 = vadd.f32 %v1175_v59, %v1127_v58  ;;  %1636 = vmatmul.bf16.gmra.mxu0 %v3568_v7  ;;  %v1081_v20 = vadd.f32 %v1080_v44, %v1032_v46  ;;  %v3645_v58 = vld [vmem:[#allocation10] sm:$0xf] }
 0x1bd   : > { %v3648_v59 = vperm.slane %v3645_v58, 0 }
 0x1be   : > { %v3624_v45 = vpack.c.bf16 %v1176_v62, %v1174_v54  ;;  %1734 = vmatmul.bf16.gmra.mxu2 %v3568_v7 }
 0x1c0   : > { %1680 = vmatmul.bf16.gmra.mxu1 %v3624_v45  ;;  %1778 = vmatmul.bf16.gmra.mxu3 %v3624_v45 }
 0x1c1   : > { %v1129_v4 = vpop.f32.mrf.mxu2  ;;  %v1033_v6 = vpop.f32.mrf.mxu0 }
 0x1c2   : > { %v1178_v13 = vpop.f32.mrf.mxu3  ;;  %v1082_v15 = vpop.f32.mrf.mxu1  ;;  %v1034_v8 = vadd.f32 %v1033_v6, %v3575_v37  ;;  %v1130_v9 = vadd.f32 %v1129_v4, %v1081_v20 }
 0x1c4   : > { %v1083_v22 = vadd.f32 %v1082_v15, %v1034_v8  ;;  %v1179_v2 = vadd.f32 %v1178_v13, %v1130_v9 }
 0x1c9   : > { %v1131_v0 = vpop.f32.mrf.mxu2  ;;  %v1036_v11 = vpop.f32.mrf.mxu0 }
 0x1ca   : > { %v1132_v29 = vadd.f32 %v1131_v0, %v1083_v22  ;;  %v1180_v1 = vpop.f32.mrf.mxu3  ;;  %v1085_v49 = vpop.f32.mrf.mxu1  ;;  %v1037_v3 = vadd.f32 %v1036_v11, %v3575_v37 }
 0x1cc   : > { %v1181_v30 = vadd.f32 %v1180_v1, %v1132_v29  ;;  %1641 = vmatmul.bf16.gmra.mxu0 %v3578_v28  ;;  %v1086_v52 = vadd.f32 %v1085_v49, %v1037_v3 }
 0x1ce   : > { %v3632_v31 = vpack.c.bf16 %v1181_v30, %v1179_v2  ;;  %1739 = vmatmul.bf16.gmra.mxu2 %v3578_v28 }
 0x1d0   : > { %1685 = vmatmul.bf16.gmra.mxu1 %v3632_v31  ;;  %1783 = vmatmul.bf16.gmra.mxu3 %v3632_v31 }
 0x1d1   : > { %v1134_v50 = vpop.f32.mrf.mxu2  ;;  %v1038_v33 = vpop.f32.mrf.mxu0 }
 0x1d2   : > { %v1183_v51 = vpop.f32.mrf.mxu3  ;;  %v1039_v34 = vadd.f32 %v1038_v33, %v3575_v37  ;;  %v1087_v35 = vpop.f32.mrf.mxu1  ;;  %v1135_v36 = vadd.f32 %v1134_v50, %v1086_v52 }
 0x1d4   : > { %v1088_v38 = vadd.f32 %v1087_v35, %v1039_v34  ;;  %v1184_v42 = vadd.f32 %v1183_v51, %v1135_v36 }
 0x1d9   : > { %v1136_v24 = vpop.f32.mrf.mxu2  ;;  %v1607_v25 = vpop.f32.mrf.mxu0 }
 0x1da   : > { %v1137_v40 = vadd.f32 %v1136_v24, %v1088_v38  ;;  %v1185_v41 = vpop.f32.mrf.mxu3  ;;  %v1608_v53 = vadd.f32 %v1607_v25, %v3648_v59 }
 0x1dc   : > { %v1186_v43 = vadd.f32 %v1185_v41, %v1137_v40  ;;  %1802 = vmatmul.bf16.vlgmr.msrb.gmra.mxu0 %v3520_v23 }
 0x1de   : > { %v3640_v56 = vpack.c.bf16 %v1186_v43, %v1184_v42  ;;  %1900 = vmatmul.bf16.vlgmr.msrb.gmra.mxu2 %v3520_v23  ;;  %v3653_v23 = vperm.slane %v3645_v58, 1 }
 0x1e0   : > { %1690 = vmatmul.bf16.gmra.mxu1 %v3640_v56  ;;  %1788 = vmatmul.bf16.gmra.mxu3 %v3640_v56 }
 0x1e1   : > { %v1705_v37 = vpop.f32.mrf.mxu2  ;;  %v1609_v18 = vpop.f32.mrf.mxu0 }
 0x1e2   : > { %v1706_v62 = vadd.f32 %v1705_v37, %v3653_v23  ;;  %v1610_v63 = vadd.f32 %v1609_v18, %v3648_v59 }
 0x1e9   : > { %v1707_v60 = vpop.f32.mrf.mxu2  ;;  %v1612_v48 = vpop.f32.mrf.mxu0 }
 0x1ea   : > { %v1708_v6 = vadd.f32 %v1707_v60, %v3653_v23 }
 0x1ec   : > { %1807 = vmatmul.bf16.gmra.mxu0 %v3528_v5 }
 0x1ed   : > { %v1656_v44 = vpop.f32.mrf.mxu1 }
 0x1ee   : > { %v1657_v61 = vadd.f32 %v1656_v44, %v1608_v53  ;;  %1905 = vmatmul.bf16.gmra.mxu2 %v3528_v5 }
 0x1f0   : > { %1990 = vst [vmem:[%s3658_s24] sm:$0xff] %v1657_v61  ;;  %1851 = vmatmul.bf16.vlgmr.msrb.gmra.mxu1 %v3584_v14  ;;  %1949 = vmatmul.bf16.vlgmr.msrb.gmra.mxu3 %v3584_v14  ;;  %v1613_v14 = vadd.f32 %v1612_v48, %v3648_v59 }
 0x1f1   : > { %v1710_v54 = vpop.f32.mrf.mxu2  ;;  %v1614_v46 = vpop.f32.mrf.mxu0 }
 0x1f2   : > { %v1711_v9 = vadd.f32 %v1710_v54, %v3653_v23  ;;  %v1615_v29 = vadd.f32 %v1614_v46, %v3648_v59 }
 0x1f3   : > { %v1754_v57 = vpop.f32.mrf.mxu3 }
 0x1f4   : > { %v1755_v5 = vadd.f32 %v1754_v57, %v1706_v62 }
 0x1f5   : > { %v1658_v4 = vpop.f32.mrf.mxu1 }
 0x1f6   : > { %1991 = vst [vmem:[%s3658_s24 + $0x8] sm:$0xff] %v1755_v5  ;;  %v1659_v47 = vadd.f32 %v1658_v4, %v1610_v63 }
 0x1f8   : > { %1994 = vst [vmem:[%s3658_s24 + $0x20] sm:$0xff] %v1659_v47 }
 0x1f9   : > { %v1712_v13 = vpop.f32.mrf.mxu2  ;;  %v1617_v15 = vpop.f32.mrf.mxu0 }
 0x1fa   : > { %v1713_v30 = vadd.f32 %v1712_v13, %v3653_v23 }
 0x1fb   : > { %v1756_v16 = vpop.f32.mrf.mxu3 }
 0x1fc   : > { %v1757_v17 = vadd.f32 %v1756_v16, %v1708_v6  ;;  %1812 = vmatmul.bf16.gmra.mxu0 %v3536_v27 }
 0x1fd   : > { %v1661_v20 = vpop.f32.mrf.mxu1 }
 0x1fe   : > { %1995 = vst [vmem:[%s3658_s24 + $0x28] sm:$0xff] %v1757_v17  ;;  %v1662_v8 = vadd.f32 %v1661_v20, %v1613_v14  ;;  %1910 = vmatmul.bf16.gmra.mxu2 %v3536_v27 }
 0x200   : > { %1998 = vst [vmem:[%s3658_s24 + $0x40] sm:$0xff] %v1662_v8  ;;  %1856 = vmatmul.bf16.gmra.mxu1 %v3592_v39  ;;  %1954 = vmatmul.bf16.gmra.mxu3 %v3592_v39  ;;  %v1618_v39 = vadd.f32 %v1617_v15, %v3648_v59 }
 0x201   : > { %v1715_v21 = vpop.f32.mrf.mxu2  ;;  %v1619_v22 = vpop.f32.mrf.mxu0 }
 0x202   : > { %v1716_v34 = vadd.f32 %v1715_v21, %v3653_v23  ;;  %v1620_v38 = vadd.f32 %v1619_v22, %v3648_v59 }
 0x203   : > { %v1759_v0 = vpop.f32.mrf.mxu3 }
 0x204   : > { %v1760_v1 = vadd.f32 %v1759_v0, %v1711_v9 }
 0x205   : > { %v1663_v11 = vpop.f32.mrf.mxu1 }
 0x206   : > { %1999 = vst [vmem:[%s3658_s24 + $0x48] sm:$0xff] %v1760_v1  ;;  %v1664_v2 = vadd.f32 %v1663_v11, %v1615_v29 }
 0x208   : > { %2002 = vst [vmem:[%s3658_s24 + $0x60] sm:$0xff] %v1664_v2 }
 0x209   : > { %v1717_v27 = vpop.f32.mrf.mxu2  ;;  %v1622_v49 = vpop.f32.mrf.mxu0 }
 0x20a   : > { %v1718_v41 = vadd.f32 %v1717_v27, %v3653_v23 }
 0x20b   : > { %v1761_v3 = vpop.f32.mrf.mxu3 }
 0x20c   : > { %v1762_v50 = vadd.f32 %v1761_v3, %v1713_v30  ;;  %1817 = vmatmul.bf16.gmra.mxu0 %v3544_v32 }
 0x20d   : > { %v1666_v51 = vpop.f32.mrf.mxu1 }
 0x20e   : > { %2003 = vst [vmem:[%s3658_s24 + $0x68] sm:$0xff] %v1762_v50  ;;  %v1667_v33 = vadd.f32 %v1666_v51, %v1618_v39  ;;  %1915 = vmatmul.bf16.gmra.mxu2 %v3544_v32 }
 0x210   : > { %2006 = vst [vmem:[%s3658_s24 + $0x80] sm:$0xff] %v1667_v33  ;;  %1861 = vmatmul.bf16.gmra.mxu1 %v3600_v19  ;;  %1959 = vmatmul.bf16.gmra.mxu3 %v3600_v19  ;;  %v1623_v19 = vadd.f32 %v1622_v49, %v3648_v59 }
 0x211   : > { %v1720_v52 = vpop.f32.mrf.mxu2  ;;  %v1624_v35 = vpop.f32.mrf.mxu0 }
 0x212   : > { %v1721_v53 = vadd.f32 %v1720_v52, %v3653_v23  ;;  %v1625_v54 = vadd.f32 %v1624_v35, %v3648_v59 }
 0x213   : > { %v1764_v36 = vpop.f32.mrf.mxu3 }
 0x214   : > { %v1765_v24 = vadd.f32 %v1764_v36, %v1716_v34 }
 0x215   : > { %v1668_v40 = vpop.f32.mrf.mxu1 }
 0x216   : > { %2007 = vst [vmem:[%s3658_s24 + $0x88] sm:$0xff] %v1765_v24  ;;  %v1669_v25 = vadd.f32 %v1668_v40, %v1620_v38 }
 0x218   : > { %2010 = vst [vmem:[%s3658_s24 + $0xa0] sm:$0xff] %v1669_v25 }
 0x219   : > { %v1722_v32 = vpop.f32.mrf.mxu2  ;;  %v1627_v42 = vpop.f32.mrf.mxu0 }
 0x21a   : > { %v1723_v63 = vadd.f32 %v1722_v32, %v3653_v23 }
 0x21b   : > { %v1766_v43 = vpop.f32.mrf.mxu3 }
 0x21c   : > { %v1767_v37 = vadd.f32 %v1766_v43, %v1718_v41  ;;  %1822 = vmatmul.bf16.gmra.mxu0 %v3552_v12 }
 0x21d   : > { %v1671_v18 = vpop.f32.mrf.mxu1 }
 0x21e   : > { %2011 = vst [vmem:[%s3658_s24 + $0xa8] sm:$0xff] %v1767_v37  ;;  %v1672_v60 = vadd.f32 %v1671_v18, %v1623_v19  ;;  %1920 = vmatmul.bf16.gmra.mxu2 %v3552_v12 }
 0x220   : > { %2014 = vst [vmem:[%s3658_s24 + $0xc0] sm:$0xff] %v1672_v60  ;;  %1866 = vmatmul.bf16.gmra.mxu1 %v3608_v26  ;;  %1964 = vmatmul.bf16.gmra.mxu3 %v3608_v26  ;;  %v1628_v26 = vadd.f32 %v1627_v42, %v3648_v59 }
 0x221   : > { %v1725_v48 = vpop.f32.mrf.mxu2  ;;  %v1629_v44 = vpop.f32.mrf.mxu0 }
 0x222   : > { %v1726_v16 = vadd.f32 %v1725_v48, %v3653_v23  ;;  %v1630_v20 = vadd.f32 %v1629_v44, %v3648_v59 }
 0x223   : > { %v1769_v61 = vpop.f32.mrf.mxu3 }
 0x224   : > { %v1770_v62 = vadd.f32 %v1769_v61, %v1721_v53 }
 0x225   : > { %v1673_v46 = vpop.f32.mrf.mxu1 }
 0x226   : > { %2015 = vst [vmem:[%s3658_s24 + $0xc8] sm:$0xff] %v1770_v62  ;;  %v1674_v57 = vadd.f32 %v1673_v46, %v1625_v54 }
 0x228   : > { %2018 = vst [vmem:[%s3658_s24 + $0xe0] sm:$0xff] %v1674_v57 }
 0x229   : > { %v1727_v12 = vpop.f32.mrf.mxu2  ;;  %v1632_v5 = vpop.f32.mrf.mxu0 }
 0x22a   : > { %v1728_v22 = vadd.f32 %v1727_v12, %v3653_v23 }
 0x22b   : > { %v1771_v4 = vpop.f32.mrf.mxu3 }
 0x22c   : > { %v1772_v47 = vadd.f32 %v1771_v4, %v1723_v63  ;;  %1827 = vmatmul.bf16.gmra.mxu0 %v3560_v55 }
 0x22d   : > { %v1676_v13 = vpop.f32.mrf.mxu1 }
 0x22e   : > { %2019 = vst [vmem:[%s3658_s24 + $0xe8] sm:$0xff] %v1772_v47  ;;  %v1677_v6 = vadd.f32 %v1676_v13, %v1628_v26  ;;  %1925 = vmatmul.bf16.gmra.mxu2 %v3560_v55  ;;  %v3749_v26 = vperm.slane %v3645_v58, 2 }
 0x230   : > { %2022 = vst [vmem:[%s3658_s24 + $0x100] sm:$0xff] %v1677_v6  ;;  %1871 = vmatmul.bf16.gmra.mxu1 %v3616_v10  ;;  %1969 = vmatmul.bf16.gmra.mxu3 %v3616_v10  ;;  %v1633_v10 = vadd.f32 %v1632_v5, %v3648_v59 }
 0x231   : > { %v1730_v15 = vpop.f32.mrf.mxu2  ;;  %v1634_v14 = vpop.f32.mrf.mxu0 }
 0x232   : > { %v1731_v30 = vadd.f32 %v1730_v15, %v3653_v23  ;;  %v1635_v39 = vadd.f32 %v1634_v14, %v3648_v59  ;;  %v3755_v14 = vperm.slane %v3645_v58, 3 }
 0x233   : > { %v1774_v17 = vpop.f32.mrf.mxu3 }
 0x234   : > { %v1775_v8 = vadd.f32 %v1774_v17, %v1726_v16 }
 0x235   : > { %v1678_v21 = vpop.f32.mrf.mxu1 }
 0x236   : > { %2023 = vst [vmem:[%s3658_s24 + $0x108] sm:$0xff] %v1775_v8  ;;  %v1679_v9 = vadd.f32 %v1678_v21, %v1630_v20 }
 0x238   : > { %2026 = vst [vmem:[%s3658_s24 + $0x120] sm:$0xff] %v1679_v9 }
 0x239   : > { %v1732_v55 = vpop.f32.mrf.mxu2  ;;  %v1637_v0 = vpop.f32.mrf.mxu0 }
 0x23a   : > { %v1733_v52 = vadd.f32 %v1732_v55, %v3653_v23 }
 0x23b   : > { %v1776_v29 = vpop.f32.mrf.mxu3 }
 0x23c   : > { %v1777_v1 = vadd.f32 %v1776_v29, %v1728_v22  ;;  %1832 = vmatmul.bf16.gmra.mxu0 %v3568_v7 }
 0x23d   : > { %v1681_v11 = vpop.f32.mrf.mxu1 }
 0x23e   : > { %2027 = vst [vmem:[%s3658_s24 + $0x128] sm:$0xff] %v1777_v1  ;;  %v1682_v2 = vadd.f32 %v1681_v11, %v1633_v10  ;;  %1930 = vmatmul.bf16.gmra.mxu2 %v3568_v7 }
 0x240   : > { %2030 = vst [vmem:[%s3658_s24 + $0x140] sm:$0xff] %v1682_v2  ;;  %1876 = vmatmul.bf16.gmra.mxu1 %v3624_v45  ;;  %1974 = vmatmul.bf16.gmra.mxu3 %v3624_v45  ;;  %v1638_v45 = vadd.f32 %v1637_v0, %v3648_v59 }
 0x241   : > { %v1735_v27 = vpop.f32.mrf.mxu2  ;;  %v1639_v49 = vpop.f32.mrf.mxu0 }
 0x242   : > { %v1736_v25 = vadd.f32 %v1735_v27, %v3653_v23  ;;  %v1640_v42 = vadd.f32 %v1639_v49, %v3648_v59 }
 0x243   : > { %v1779_v3 = vpop.f32.mrf.mxu3 }
 0x244   : > { %v1780_v50 = vadd.f32 %v1779_v3, %v1731_v30 }
 0x245   : > { %v1683_v51 = vpop.f32.mrf.mxu1 }
 0x246   : > { %2031 = vst [vmem:[%s3658_s24 + $0x148] sm:$0xff] %v1780_v50  ;;  %v1684_v33 = vadd.f32 %v1683_v51, %v1635_v39 }
 0x248   : > { %2034 = vst [vmem:[%s3658_s24 + $0x160] sm:$0xff] %v1684_v33 }
 0x249   : > { %v1737_v7 = vpop.f32.mrf.mxu2  ;;  %v1642_v34 = vpop.f32.mrf.mxu0 }
 0x24a   : > { %v1738_v18 = vadd.f32 %v1737_v7, %v3653_v23 }
 0x24b   : > { %v1781_v35 = vpop.f32.mrf.mxu3 }
 0x24c   : > { %v1782_v36 = vadd.f32 %v1781_v35, %v1733_v52  ;;  %1837 = vmatmul.bf16.gmra.mxu0 %v3578_v28 }
 0x24d   : > { %v1686_v38 = vpop.f32.mrf.mxu1 }
 0x24e   : > { %2035 = vst [vmem:[%s3658_s24 + $0x168] sm:$0xff] %v1782_v36  ;;  %v1687_v24 = vadd.f32 %v1686_v38, %v1638_v45  ;;  %1935 = vmatmul.bf16.gmra.mxu2 %v3578_v28 }
 0x250   : > { %2038 = vst [vmem:[%s3658_s24 + $0x180] sm:$0xff] %v1687_v24  ;;  %1881 = vmatmul.bf16.gmra.mxu1 %v3632_v31  ;;  %1979 = vmatmul.bf16.gmra.mxu3 %v3632_v31  ;;  %v1643_v31 = vadd.f32 %v1642_v34, %v3648_v59 }
 0x251   : > { %v1740_v40 = vpop.f32.mrf.mxu2  ;;  %v1644_v32 = vpop.f32.mrf.mxu0 }
 0x252   : > { %v1741_v62 = vadd.f32 %v1740_v40, %v3653_v23  ;;  %v1645_v12 = vadd.f32 %v1644_v32, %v3648_v59 }
 0x253   : > { %v1784_v41 = vpop.f32.mrf.mxu3 }
 0x254   : > { %v1785_v43 = vadd.f32 %v1784_v41, %v1736_v25 }
 0x255   : > { %v1688_v19 = vpop.f32.mrf.mxu1 }
 0x256   : > { %2039 = vst [vmem:[%s3658_s24 + $0x188] sm:$0xff] %v1785_v43  ;;  %v1689_v37 = vadd.f32 %v1688_v19, %v1640_v42 }
 0x258   : > { %2042 = vst [vmem:[%s3658_s24 + $0x1a0] sm:$0xff] %v1689_v37 }
 0x259   : > { %v1742_v28 = vpop.f32.mrf.mxu2  ;;  %v1803_v60 = vpop.f32.mrf.mxu0 }
 0x25a   : > { %v1804_v15 = vadd.f32 %v1803_v60, %v3749_v26 }
 0x25b   : > { %v1786_v48 = vpop.f32.mrf.mxu3 }
 0x25c   : > { %v1787_v53 = vadd.f32 %v1786_v48, %v1738_v18 }
 0x25d   : > { %v1691_v44 = vpop.f32.mrf.mxu1 }
 0x25e   : > { %2043 = vst [vmem:[%s3658_s24 + $0x1a8] sm:$0xff] %v1787_v53  ;;  %v1692_v61 = vadd.f32 %v1691_v44, %v1643_v31 }
 0x260   : > { %2046 = vst [vmem:[%s3658_s24 + $0x1c0] sm:$0xff] %v1692_v61  ;;  %1886 = vmatmul.bf16.gmra.mxu1 %v3640_v56  ;;  %1984 = vmatmul.bf16.gmra.mxu3 %v3640_v56  ;;  %v1743_v56 = vadd.f32 %v1742_v28, %v3653_v23 }
 0x261   : > { %v1901_v54 = vpop.f32.mrf.mxu2  ;;  %v1805_v46 = vpop.f32.mrf.mxu0 }
 0x262   : > { %v1902_v8 = vadd.f32 %v1901_v54, %v3755_v14  ;;  %v1806_v9 = vadd.f32 %v1805_v46, %v3749_v26 }
 0x263   : > { %v1789_v57 = vpop.f32.mrf.mxu3 }
 0x264   : > { %v1790_v63 = vadd.f32 %v1789_v57, %v1741_v62 }
 0x265   : > { %v1693_v5 = vpop.f32.mrf.mxu1 }
 0x266   : > { %2047 = vst [vmem:[%s3658_s24 + $0x1c8] sm:$0xff] %v1790_v63  ;;  %v1694_v4 = vadd.f32 %v1693_v5, %v1645_v12 }
 0x268   : > { %2050 = vst [vmem:[%s3658_s24 + $0x1e0] sm:$0xff] %v1694_v4 }
 0x269   : > { %v1903_v47 = vpop.f32.mrf.mxu2  ;;  %v1808_v13 = vpop.f32.mrf.mxu0 }
 0x26a   : > { %v1904_v58 = vadd.f32 %v1903_v47, %v3755_v14  ;;  %v1809_v11 = vadd.f32 %v1808_v13, %v3749_v26 }
 0x26b   : > { %v1791_v6 = vpop.f32.mrf.mxu3 }
 0x26c   : > { %v1792_v16 = vadd.f32 %v1791_v6, %v1743_v56 }
 0x26d   : > { %v1852_v59 = vpop.f32.mrf.mxu1 }
 0x26e   : > { %2051 = vst [vmem:[%s3658_s24 + $0x1e8] sm:$0xff] %v1792_v16  ;;  %v1853_v17 = vadd.f32 %v1852_v59, %v1804_v15 }
 0x270   : > { %1992 = vst [vmem:[%s3658_s24 + $0x10] sm:$0xff] %v1853_v17 }
 0x271   : > { %v1906_v20 = vpop.f32.mrf.mxu2  ;;  %v1810_v21 = vpop.f32.mrf.mxu0 }
 0x272   : > { %v1907_v3 = vadd.f32 %v1906_v20, %v3755_v14  ;;  %v1811_v51 = vadd.f32 %v1810_v21, %v3749_v26 }
 0x273   : > { %v1950_v23 = vpop.f32.mrf.mxu3 }
 0x274   : > { %v1951_v55 = vadd.f32 %v1950_v23, %v1902_v8 }
 0x275   : > { %v1854_v22 = vpop.f32.mrf.mxu1 }
 0x276   : > { %1993 = vst [vmem:[%s3658_s24 + $0x18] sm:$0xff] %v1951_v55  ;;  %v1855_v0 = vadd.f32 %v1854_v22, %v1806_v9 }
 0x278   : > { %1996 = vst [vmem:[%s3658_s24 + $0x30] sm:$0xff] %v1855_v0 }
 0x279   : > { %v1908_v29 = vpop.f32.mrf.mxu2  ;;  %v1813_v10 = vpop.f32.mrf.mxu0 }
 0x27a   : > { %v1909_v35 = vadd.f32 %v1908_v29, %v3755_v14  ;;  %v1814_v38 = vadd.f32 %v1813_v10, %v3749_v26 }
 0x27b   : > { %v1952_v1 = vpop.f32.mrf.mxu3 }
 0x27c   : > { %v1953_v2 = vadd.f32 %v1952_v1, %v1904_v58 }
 0x27d   : > { %v1857_v27 = vpop.f32.mrf.mxu1 }
 0x27e   : > { %1997 = vst [vmem:[%s3658_s24 + $0x38] sm:$0xff] %v1953_v2  ;;  %v1858_v30 = vadd.f32 %v1857_v27, %v1809_v11 }
 0x280   : > { %2000 = vst [vmem:[%s3658_s24 + $0x50] sm:$0xff] %v1858_v30 }
 0x281   : > { %v1911_v49 = vpop.f32.mrf.mxu2  ;;  %v1815_v39 = vpop.f32.mrf.mxu0 }
 0x282   : > { %v1912_v41 = vadd.f32 %v1911_v49, %v3755_v14  ;;  %v1816_v19 = vadd.f32 %v1815_v39, %v3749_v26 }
 0x283   : > { %v1955_v50 = vpop.f32.mrf.mxu3 }
 0x284   : > { %v1956_v33 = vadd.f32 %v1955_v50, %v1907_v3 }
 0x285   : > { %v1859_v7 = vpop.f32.mrf.mxu1 }
 0x286   : > { %2001 = vst [vmem:[%s3658_s24 + $0x58] sm:$0xff] %v1956_v33  ;;  %v1860_v52 = vadd.f32 %v1859_v7, %v1811_v51 }
 0x288   : > { %2004 = vst [vmem:[%s3658_s24 + $0x70] sm:$0xff] %v1860_v52 }
 0x289   : > { %v1913_v34 = vpop.f32.mrf.mxu2  ;;  %v1818_v45 = vpop.f32.mrf.mxu0 }
 0x28a   : > { %v1914_v48 = vadd.f32 %v1913_v34, %v3755_v14  ;;  %v1819_v44 = vadd.f32 %v1818_v45, %v3749_v26 }
 0x28b   : > { %v1957_v36 = vpop.f32.mrf.mxu3 }
 0x28c   : > { %v1958_v24 = vadd.f32 %v1957_v36, %v1909_v35 }
 0x28d   : > { %v1862_v40 = vpop.f32.mrf.mxu1 }
 0x28e   : > { %2005 = vst [vmem:[%s3658_s24 + $0x78] sm:$0xff] %v1958_v24  ;;  %v1863_v25 = vadd.f32 %v1862_v40, %v1814_v38 }
 0x290   : > { %2008 = vst [vmem:[%s3658_s24 + $0x90] sm:$0xff] %v1863_v25 }
 0x291   : > { %v1916_v32 = vpop.f32.mrf.mxu2  ;;  %v1820_v42 = vpop.f32.mrf.mxu0 }
 0x292   : > { %v1917_v57 = vadd.f32 %v1916_v32, %v3755_v14  ;;  %v1821_v63 = vadd.f32 %v1820_v42, %v3749_v26 }
 0x293   : > { %v1960_v43 = vpop.f32.mrf.mxu3 }
 0x294   : > { %v1961_v37 = vadd.f32 %v1960_v43, %v1912_v41 }
 0x295   : > { %v1864_v28 = vpop.f32.mrf.mxu1 }
 0x296   : > { %2009 = vst [vmem:[%s3658_s24 + $0x98] sm:$0xff] %v1961_v37  ;;  %v1865_v18 = vadd.f32 %v1864_v28, %v1816_v19 }
 0x298   : > { %2012 = vst [vmem:[%s3658_s24 + $0xb0] sm:$0xff] %v1865_v18 }
 0x299   : > { %v1918_v60 = vpop.f32.mrf.mxu2  ;;  %v1823_v31 = vpop.f32.mrf.mxu0 }
 0x29a   : > { %v1919_v13 = vadd.f32 %v1918_v60, %v3755_v14  ;;  %v1824_v16 = vadd.f32 %v1823_v31, %v3749_v26 }
 0x29b   : > { %v1962_v53 = vpop.f32.mrf.mxu3 }
 0x29c   : > { %v1963_v61 = vadd.f32 %v1962_v53, %v1914_v48 }
 0x29d   : > { %v1867_v54 = vpop.f32.mrf.mxu1 }
 0x29e   : > { %2013 = vst [vmem:[%s3658_s24 + $0xb8] sm:$0xff] %v1963_v61  ;;  %v1868_v62 = vadd.f32 %v1867_v54, %v1819_v44 }
 0x2a0   : > { %2016 = vst [vmem:[%s3658_s24 + $0xd0] sm:$0xff] %v1868_v62 }
 0x2a1   : > { %v1921_v46 = vpop.f32.mrf.mxu2  ;;  %v1825_v4 = vpop.f32.mrf.mxu0 }
 0x2a2   : > { %v1922_v21 = vadd.f32 %v1921_v46, %v3755_v14  ;;  %v1826_v9 = vadd.f32 %v1825_v4, %v3749_v26 }
 0x2a3   : > { %v1965_v12 = vpop.f32.mrf.mxu3 }
 0x2a4   : > { %v1966_v5 = vadd.f32 %v1965_v12, %v1917_v57 }
 0x2a5   : > { %v1869_v47 = vpop.f32.mrf.mxu1 }
 0x2a6   : > { %2017 = vst [vmem:[%s3658_s24 + $0xd8] sm:$0xff] %v1966_v5  ;;  %v1870_v56 = vadd.f32 %v1869_v47, %v1821_v63 }
 0x2a8   : > { %2020 = vst [vmem:[%s3658_s24 + $0xf0] sm:$0xff] %v1870_v56 }
 0x2a9   : > { %v1923_v6 = vpop.f32.mrf.mxu2  ;;  %v1828_v8 = vpop.f32.mrf.mxu0 }
 0x2aa   : > { %v1924_v10 = vadd.f32 %v1923_v6, %v3755_v14  ;;  %v1829_v11 = vadd.f32 %v1828_v8, %v3749_v26 }
 0x2ab   : > { %v1967_v15 = vpop.f32.mrf.mxu3 }
 0x2ac   : > { %v1968_v59 = vadd.f32 %v1967_v15, %v1919_v13 }
 0x2ad   : > { %v1872_v17 = vpop.f32.mrf.mxu1 }
 0x2ae   : > { %2021 = vst [vmem:[%s3658_s24 + $0xf8] sm:$0xff] %v1968_v59  ;;  %v1873_v20 = vadd.f32 %v1872_v17, %v1824_v16 }
 0x2b0   : > { %2024 = vst [vmem:[%s3658_s24 + $0x110] sm:$0xff] %v1873_v20 }
 0x2b1   : > { %v1926_v22 = vpop.f32.mrf.mxu2  ;;  %v1830_v58 = vpop.f32.mrf.mxu0 }
 0x2b2   : > { %v1927_v3 = vadd.f32 %v1926_v22, %v3755_v14  ;;  %v1831_v51 = vadd.f32 %v1830_v58, %v3749_v26 }
 0x2b3   : > { %v1970_v23 = vpop.f32.mrf.mxu3 }
 0x2b4   : > { %v1971_v55 = vadd.f32 %v1970_v23, %v1922_v21 }
 0x2b5   : > { %v1874_v0 = vpop.f32.mrf.mxu1 }
 0x2b6   : > { %2025 = vst [vmem:[%s3658_s24 + $0x118] sm:$0xff] %v1971_v55  ;;  %v1875_v29 = vadd.f32 %v1874_v0, %v1826_v9 }
 0x2b8   : > { %2028 = vst [vmem:[%s3658_s24 + $0x130] sm:$0xff] %v1875_v29 }
 0x2b9   : > { %v1928_v49 = vpop.f32.mrf.mxu2  ;;  %v1833_v39 = vpop.f32.mrf.mxu0 }
 0x2ba   : > { %v1929_v35 = vadd.f32 %v1928_v49, %v3755_v14  ;;  %v1834_v36 = vadd.f32 %v1833_v39, %v3749_v26 }
 0x2bb   : > { %v1972_v1 = vpop.f32.mrf.mxu3 }
 0x2bc   : > { %v1973_v2 = vadd.f32 %v1972_v1, %v1924_v10 }
 0x2bd   : > { %v1877_v27 = vpop.f32.mrf.mxu1 }
 0x2be   : > { %2029 = vst [vmem:[%s3658_s24 + $0x138] sm:$0xff] %v1973_v2  ;;  %v1878_v30 = vadd.f32 %v1877_v27, %v1829_v11 }
 0x2c0   : > { %2032 = vst [vmem:[%s3658_s24 + $0x150] sm:$0xff] %v1878_v30 }
 0x2c1   : > { %v1931_v34 = vpop.f32.mrf.mxu2  ;;  %v1835_v24 = vpop.f32.mrf.mxu0 }
 0x2c2   : > { %v1932_v32 = vadd.f32 %v1931_v34, %v3755_v14  ;;  %v1836_v43 = vadd.f32 %v1835_v24, %v3749_v26 }
 0x2c3   : > { %v1975_v50 = vpop.f32.mrf.mxu3 }
 0x2c4   : > { %v1976_v33 = vadd.f32 %v1975_v50, %v1927_v3 }
 0x2c5   : > { %v1879_v7 = vpop.f32.mrf.mxu1 }
 0x2c6   : > { %2033 = vst [vmem:[%s3658_s24 + $0x158] sm:$0xff] %v1976_v33  ;;  %v1880_v52 = vadd.f32 %v1879_v7, %v1831_v51 }
 0x2c8   : > { %2036 = vst [vmem:[%s3658_s24 + $0x170] sm:$0xff] %v1880_v52 }
 0x2c9   : > { %v1933_v41 = vpop.f32.mrf.mxu2  ;;  %v1838_v18 = vpop.f32.mrf.mxu0 }
 0x2ca   : > { %v1934_v60 = vadd.f32 %v1933_v41, %v3755_v14  ;;  %v1839_v31 = vadd.f32 %v1838_v18, %v3749_v26 }
 0x2cb   : > { %v1977_v45 = vpop.f32.mrf.mxu3 }
 0x2cc   : > { %v1978_v38 = vadd.f32 %v1977_v45, %v1929_v35 }
 0x2cd   : > { %v1882_v40 = vpop.f32.mrf.mxu1 }
 0x2ce   : > { %2037 = vst [vmem:[%s3658_s24 + $0x178] sm:$0xff] %v1978_v38  ;;  %v1883_v25 = vadd.f32 %v1882_v40, %v1834_v36 }
 0x2d0   : > { %2040 = vst [vmem:[%s3658_s24 + $0x190] sm:$0xff] %v1883_v25 }
 0x2d1   : > { %v1936_v44 = vpop.f32.mrf.mxu2  ;;  %v1840_v62 = vpop.f32.mrf.mxu0 }
 0x2d2   : > { %v1937_v46 = vadd.f32 %v1936_v44, %v3755_v14  ;;  %v1841_v12 = vadd.f32 %v1840_v62, %v3749_v26 }
 0x2d3   : > { %v1980_v42 = vpop.f32.mrf.mxu3 }
 0x2d4   : > { %v1981_v19 = vadd.f32 %v1980_v42, %v1932_v32 }
 0x2d5   : > { %v1884_v37 = vpop.f32.mrf.mxu1 }
 0x2d6   : > { %2041 = vst [vmem:[%s3658_s24 + $0x198] sm:$0xff] %v1981_v19  ;;  %v1885_v28 = vadd.f32 %v1884_v37, %v1836_v43 }
 0x2d8   : > { %2044 = vst [vmem:[%s3658_s24 + $0x1b0] sm:$0xff] %v1885_v28 }
 0x2d9   : > { %v1938_v47 = vpop.f32.mrf.mxu2 }
 0x2da   : > { %v1939_v56 = vadd.f32 %v1938_v47, %v3755_v14 }
 0x2db   : > { %v1982_v48 = vpop.f32.mrf.mxu3 }
 0x2dc   : > { %v1983_v53 = vadd.f32 %v1982_v48, %v1934_v60 }
 0x2dd   : > { %v1887_v61 = vpop.f32.mrf.mxu1 }
 0x2de   : > { %2045 = vst [vmem:[%s3658_s24 + $0x1b8] sm:$0xff] %v1983_v53  ;;  %v1888_v54 = vadd.f32 %v1887_v61, %v1839_v31 }
 0x2e0   : > { %2048 = vst [vmem:[%s3658_s24 + $0x1d0] sm:$0xff] %v1888_v54 }
 0x2e3   : > { %v1985_v57 = vpop.f32.mrf.mxu3 }
 0x2e4   : > { %v1986_v63 = vadd.f32 %v1985_v57, %v1937_v46 }
 0x2e5   : > { %v1889_v5 = vpop.f32.mrf.mxu1 }
 0x2e6   : > { %2049 = vst [vmem:[%s3658_s24 + $0x1d8] sm:$0xff] %v1986_v63  ;;  %v1890_v4 = vadd.f32 %v1889_v5, %v1841_v12 }
 0x2e8   : > { %2052 = vst [vmem:[%s3658_s24 + $0x1f0] sm:$0xff] %v1890_v4 }
 0x2eb   : > { %v1987_v13 = vpop.f32.mrf.mxu3 }
 0x2ec   : > { %v1988_v26 = vadd.f32 %v1987_v13, %v1939_v56 }
 0x2ee   : > { %2053 = vst [vmem:[%s3658_s24 + $0x1f8] sm:$0xff] %v1988_v26 }
 0x2ef   : > { %3122 = shalt.err (!%p3119_p10)
}
 0x2f0   : > { %s3181_s28 = smov 512   ;;  %s3182_s13 = smov 32  }
 0x2f1   : > { %2868 = dma.vmem_to_hbm [thread:$0]  (%p3297_p3), %s2069_s9, 8192, %s2071_s7, %s2055_s22, %s3181_s28, %s3181_s28, %s3182_s13  }
 0x2f2 PF: > { %s2085_s24 = sand.u32 1, %s3157_s18   ;;  %p3867_p12 = scmp.ge.s32.totalorder %s3169_s21, 2 }
 0x2f3   : > { %s2086_s29 = scalar_lea.sflag [#allocation4], %s2085_s24 }
 0x2f4   : > { %p2888_p13 = pnand %p3867_p12, %p3248_p6 }
 0x2f6   : > { %p2889_p0 = pneg %p2888_p13 }
 0x2f8   : > { %3152 = dma.done.wait (%p2889_p0), %s2086_s29, 8192  }
 0x2f9   : > { %3154 = vsyncadd (%p2889_p0), %s2086_s29, 4294959104  ;;  %p20_p5 = scmp.ge.s32.totalorder %s3287_s11, 4   ;;  %s3868_s18 = smov %s3161_s19 }
 0x2fa   : > { %s3869_s19 = smov %s3165_s20  ;;  %s3870_s20 = smov %s3303_s15 }
 0x2fb   : > { %s3871_s21 = smov %s3287_s11  ;;  %22 = sbr.rel (!%p20_p5) target bundleno = 7 (0x7), region = 101 }
 0x300   :  { %2092 = vsyncpa [#allocation3], 1 }
 0x301   :  { %2094 = vsyncpa [#allocation3 + $0x1], 1 }
 0x302   :  { %2095 = vsyncpa [#allocation6], 1 }
 0x303   :  { %2096 = vsyncpa [#allocation9], 1 }
 0x304   :  { %2097 = vsyncpa [#allocation4], 1 }
 0x305   :  { %2099 = vsyncpa [#allocation4 + $0x1], 1 }

</bundles_post_ra>
